<compile_context>
chip_gen: v7x
topology: tpu7x:2x2x1
jax: 0.10.0
libtpu: 0.0.40
codegen_flags: <defaults>
</compile_context>

<pallas_src>
import functools

import jax
import jax.numpy as jnp
from jax.experimental import pallas as pl
from jax.experimental.pallas import tpu as pltpu


def _mlp_kernel(n_layers, input_dim, compute_dtype, x_ref, *refs):
    """Fused MLP kernel (batch-on-lanes).

    refs = (W0, b0, W1, b1, ..., W_{L-1}, b_{L-1}, out_ref)
      W_l : (d_out_l, d_in_l)   compute_dtype   (torch nn.Linear layout)
      b_l : (d_out_l, 1)        float32
      x   : (input_dim, tm)     compute_dtype
      out : (output_dim, tm)
    tanh after every layer except the last (matches nn.Tanh() default).
    """
    out_ref = refs[-1]
    params = refs[:-1]
    # Full f32 precision for the MXU on the f32 path; default for bf16 inputs.
    prec = jax.lax.Precision.HIGHEST if compute_dtype == jnp.float32 else None

    def linear(layer, h):
        w_ref = params[2 * layer]
        b_ref = params[2 * layer + 1]
        if layer == 0 and input_dim <= 8:
            # Tiny contraction: VPU outer-product sum (exact f32) instead of a
            # heavily padded MXU pass; the input_dim weight columns are reused
            # across the whole tile.
            w0 = w_ref[...].astype(jnp.float32)               # (d_out, input_dim)
            hf = h.astype(jnp.float32)                        # (input_dim, tm)
            y = jnp.zeros((w_ref.shape[0], h.shape[1]), jnp.float32)
            for k in range(input_dim):
                y = y + w0[:, k:k + 1] * hf[k:k + 1, :]
        else:
            y = jnp.dot(w_ref[...], h,
                        preferred_element_type=jnp.float32, precision=prec)
        return y + b_ref[...]                                 # bias kept in f32

    h = x_ref[...]
    for layer in range(n_layers):
        h = linear(layer, h)                                  # f32 (d_out, tm)
        if layer != n_layers - 1:
            if h.dtype != compute_dtype:
                h = h.astype(compute_dtype)                   # bf16 tanh on v6e/v7x
            h = jnp.tanh(h)
    out_ref[...] = h.astype(out_ref.dtype)                    # lane-dense store


def standard_feedforward_nn(x, weights, biases, *, batch_tile=256,
                            compute_dtype=jnp.float32):
    """Fused PINN MLP forward.

    x:       (N, input_dim) float32 (samples x features, as in the torch module)
    weights: list; weights[l] has torch nn.Linear layout (d_out_l, d_in_l)
    biases:  list; biases[l] has shape (d_out_l,)
    returns: (N, output_dim) in x.dtype
    """
    n_layers = len(weights)
    N, input_dim = x.shape
    out_dim = weights[-1].shape[0]

    assert batch_tile % 128 == 0, "batch tile must be a multiple of the lane width"
    if N <= batch_tile:
        tm = N                       # single tile; full-extent blocks are always legal
        n_pad = N
    else:
        tm = batch_tile
        n_pad = ((N + tm - 1) // tm) * tm      # zero-pad batch to a tile multiple
    grid = (n_pad // tm,)

    # Batch-on-lanes: activations travel as (features, batch).  Casts, transpose
    # and padding happen once here in the wrapper, never per grid step.
    x_t = jnp.transpose(x).astype(compute_dtype)                  # (input_dim, N)
    if n_pad != N:
        x_t = jnp.pad(x_t, ((0, 0), (0, n_pad - N)))
    ws = [w.astype(compute_dtype) for w in weights]
    bs = [b.reshape(-1, 1).astype(jnp.float32) for b in biases]   # (d_out, 1)

    in_specs = [pl.BlockSpec((input_dim, tm), lambda i: (0, i))]
    flat_params = []
    for w, b in zip(ws, bs):
        # Constant index_map -> each weight/bias is DMA'd to VMEM only once.
        in_specs.append(pl.BlockSpec(w.shape, lambda i: (0, 0)))
        in_specs.append(pl.BlockSpec(b.shape, lambda i: (0, 0)))
        flat_params += [w, b]

    out_spec = pl.BlockSpec((out_dim, tm), lambda i: (0, i))      # lane-dense store

    kernel = functools.partial(_mlp_kernel, n_layers, input_dim, compute_dtype)

    out_t = pl.pallas_call(
        kernel,
        out_shape=jax.ShapeDtypeStruct((out_dim, n_pad), x.dtype),
        grid_spec=pltpu.PrefetchScalarGridSpec(
            num_scalar_prefetch=0,
            grid=grid,
            in_specs=in_specs,
            out_specs=out_spec,
        ),
        compiler_params=pltpu.CompilerParams(
            dimension_semantics=("parallel",),  # batch tiles shard across TCs (v7x)
        ),
    )(x_t, *flat_params)

    return jnp.transpose(out_t[:, :N])                            # (N, out_dim)


def init_params(key, input_dim, hidden_dim, output_dim, depth):
    """torch.nn.Linear-style init: U[-1/sqrt(fan_in), +1/sqrt(fan_in)];
    weights in torch layout (out_features, in_features).  depth+1 linear layers."""
    dims = [input_dim] + [hidden_dim] * depth + [output_dim]
    weights, biases = [], []
    for d_in, d_out in zip(dims[:-1], dims[1:]):
        key, kw, kb = jax.random.split(key, 3)
        bound = 1.0 / jnp.sqrt(jnp.float32(d_in))
        w = jax.random.uniform(kw, (d_out, d_in), jnp.float32, -bound, bound)
        b = jax.random.uniform(kb, (d_out,), jnp.float32, -bound, bound)
        weights.append(w)
        biases.append(b)
    return weights, biases


def reference_mlp(x, weights, biases):
    h = x
    for i, (w, b) in enumerate(zip(weights, biases)):
        h = jnp.dot(h, w.T, precision=jax.lax.Precision.HIGHEST) + b
        if i != len(weights) - 1:
            h = jnp.tanh(h)
    return h


if __name__ == "__main__":
    # PINN-style shapes: 2-D coordinates in, scalar out, 64-wide hidden, depth 4
    # (=> 5 linear layers, tanh between them).
    input_dim, hidden_dim, output_dim, depth = 2, 64, 1, 4
    batch = 512                       # 2 grid steps of 256 -> both v7x TCs busy

    key = jax.random.PRNGKey(0)
    key, kx = jax.random.split(key)
    x = jax.random.normal(kx, (batch, input_dim), jnp.float32)
    weights, biases = init_params(key, input_dim, hidden_dim, output_dim, depth)

    ref = reference_mlp(x, weights, biases)

    # f32 compute path (accuracy baseline).
    out = jax.block_until_ready(
        standard_feedforward_nn(x, weights, biases, batch_tile=256))
    assert out.shape == (batch, output_dim), out.shape
    assert jnp.allclose(out, ref, atol=1e-4, rtol=1e-4), "f32 kernel mismatch"

    # Ragged batch (not a multiple of the tile): exercises the zero-pad path.
    key, kx2 = jax.random.split(key)
    x_ragged = jax.random.normal(kx2, (600, input_dim), jnp.float32)
    ref_ragged = reference_mlp(x_ragged, weights, biases)
    out_ragged = jax.block_until_ready(
        standard_feedforward_nn(x_ragged, weights, biases, batch_tile=256))
    assert out_ragged.shape == (600, output_dim), out_ragged.shape
    assert jnp.allclose(out_ragged, ref_ragged, atol=1e-4, rtol=1e-4), \
        "ragged f32 kernel mismatch"

    # bf16 activation/tanh fast path for v6e/v7x (f32 accumulation kept);
    # loose tolerance — validate before using for higher-order PINN derivatives.
    out_bf16 = jax.block_until_ready(
        standard_feedforward_nn(x, weights, biases, batch_tile=256,
                                compute_dtype=jnp.bfloat16))
    assert out_bf16.shape == (batch, output_dim)
    assert jnp.max(jnp.abs(out_bf16 - ref)) < 1e-1, "bf16 kernel mismatch"

    print("KERNEL_OK")
</pallas_src>

<mosaic_0001>
module attributes {stable_mosaic.version = 11 : i64} {
  func.func @_mlp_kernel(%arg0: i32, %arg1: memref<2x256xf32, #tpu.memory_space<vmem>>, %arg2: memref<64x2xf32, #tpu.memory_space<vmem>>, %arg3: memref<64x1xf32, #tpu.memory_space<vmem>>, %arg4: memref<64x64xf32, #tpu.memory_space<vmem>>, %arg5: memref<64x1xf32, #tpu.memory_space<vmem>>, %arg6: memref<64x64xf32, #tpu.memory_space<vmem>>, %arg7: memref<64x1xf32, #tpu.memory_space<vmem>>, %arg8: memref<64x64xf32, #tpu.memory_space<vmem>>, %arg9: memref<64x1xf32, #tpu.memory_space<vmem>>, %arg10: memref<1x64xf32, #tpu.memory_space<vmem>>, %arg11: memref<1x1xf32, #tpu.memory_space<vmem>>, %arg12: memref<1x256xf32, #tpu.memory_space<vmem>>) attributes {dimension_semantics = [#tpu.dimension_semantics<parallel>], iteration_bounds = array<i64: 2>, scalar_prefetch = 0 : i64, scratch_operands = 0 : i64, tpu.core_type = #tpu.core_type<tc>, window_params = [{transform_indices = @transform_0, window_bounds = array<i64: 2, 256>}, {pipeline_mode = #tpu.pipeline_mode<synchronous>, transform_indices = @transform_1, window_bounds = array<i64: 64, 2>}, {pipeline_mode = #tpu.pipeline_mode<synchronous>, transform_indices = @transform_2, window_bounds = array<i64: 64, 1>}, {pipeline_mode = #tpu.pipeline_mode<synchronous>, transform_indices = @transform_3, window_bounds = array<i64: 64, 64>}, {pipeline_mode = #tpu.pipeline_mode<synchronous>, transform_indices = @transform_4, window_bounds = array<i64: 64, 1>}, {pipeline_mode = #tpu.pipeline_mode<synchronous>, transform_indices = @transform_5, window_bounds = array<i64: 64, 64>}, {pipeline_mode = #tpu.pipeline_mode<synchronous>, transform_indices = @transform_6, window_bounds = array<i64: 64, 1>}, {pipeline_mode = #tpu.pipeline_mode<synchronous>, transform_indices = @transform_7, window_bounds = array<i64: 64, 64>}, {pipeline_mode = #tpu.pipeline_mode<synchronous>, transform_indices = @transform_8, window_bounds = array<i64: 64, 1>}, {pipeline_mode = #tpu.pipeline_mode<synchronous>, transform_indices = @transform_9, window_bounds = array<i64: 1, 64>}, {pipeline_mode = #tpu.pipeline_mode<synchronous>, transform_indices = @transform_10, window_bounds = array<i64: 1, 1>}, {transform_indices = @transform_11, window_bounds = array<i64: 1, 256>}]} {
    %c0 = arith.constant 0 : index
    %c0_0 = arith.constant 0 : index
    %0 = vector.load %arg1[%c0, %c0_0] : memref<2x256xf32, #tpu.memory_space<vmem>>, vector<2x256xf32>
    %c0_1 = arith.constant 0 : index
    %c0_2 = arith.constant 0 : index
    %1 = vector.load %arg2[%c0_1, %c0_2] : memref<64x2xf32, #tpu.memory_space<vmem>>, vector<64x2xf32>
    %cst = arith.constant 0.000000e+00 : f32
    %2 = vector.broadcast %cst : f32 to vector<64x256xf32>
    %3 = vector.extract_strided_slice %1 {offsets = [0, 0], sizes = [64, 1], strides = [1, 1]} : vector<64x2xf32> to vector<64x1xf32>
    %4 = vector.extract_strided_slice %0 {offsets = [0, 0], sizes = [1, 256], strides = [1, 1]} : vector<2x256xf32> to vector<1x256xf32>
    %5 = vector.broadcast %3 : vector<64x1xf32> to vector<64x256xf32>
    %6 = vector.broadcast %4 : vector<1x256xf32> to vector<64x256xf32>
    %7 = arith.mulf %5, %6 : vector<64x256xf32>
    %8 = arith.addf %2, %7 : vector<64x256xf32>
    %9 = vector.extract_strided_slice %1 {offsets = [0, 1], sizes = [64, 1], strides = [1, 1]} : vector<64x2xf32> to vector<64x1xf32>
    %10 = vector.extract_strided_slice %0 {offsets = [1, 0], sizes = [1, 256], strides = [1, 1]} : vector<2x256xf32> to vector<1x256xf32>
    %11 = vector.broadcast %9 : vector<64x1xf32> to vector<64x256xf32>
    %12 = vector.broadcast %10 : vector<1x256xf32> to vector<64x256xf32>
    %13 = arith.mulf %11, %12 : vector<64x256xf32>
    %14 = arith.addf %8, %13 : vector<64x256xf32>
    %c0_3 = arith.constant 0 : index
    %c0_4 = arith.constant 0 : index
    %15 = vector.load %arg3[%c0_3, %c0_4] : memref<64x1xf32, #tpu.memory_space<vmem>>, vector<64x1xf32>
    %16 = vector.broadcast %15 : vector<64x1xf32> to vector<64x256xf32>
    %17 = arith.addf %14, %16 : vector<64x256xf32>
    %18 = math.tanh %17 : vector<64x256xf32>
    %c0_5 = arith.constant 0 : index
    %c0_6 = arith.constant 0 : index
    %19 = vector.load %arg4[%c0_5, %c0_6] : memref<64x64xf32, #tpu.memory_space<vmem>>, vector<64x64xf32>
    %cst_7 = arith.constant dense<0.000000e+00> : vector<64x256xf32>
    %20 = tpu.matmul %19, %18, %cst_7 {dimension_numbers = #tpu.dot_dimension_numbers<[1], [0], [0], [1], [0, 0, 1, 1], [], []>, precision = #tpu.contract_precision<fp32>} : vector<64x64xf32>, vector<64x256xf32>, vector<64x256xf32> -> vector<64x256xf32>
    %c0_8 = arith.constant 0 : index
    %c0_9 = arith.constant 0 : index
    %21 = vector.load %arg5[%c0_8, %c0_9] : memref<64x1xf32, #tpu.memory_space<vmem>>, vector<64x1xf32>
    %22 = vector.broadcast %21 : vector<64x1xf32> to vector<64x256xf32>
    %23 = arith.addf %20, %22 : vector<64x256xf32>
    %24 = math.tanh %23 : vector<64x256xf32>
    %c0_10 = arith.constant 0 : index
    %c0_11 = arith.constant 0 : index
    %25 = vector.load %arg6[%c0_10, %c0_11] : memref<64x64xf32, #tpu.memory_space<vmem>>, vector<64x64xf32>
    %cst_12 = arith.constant dense<0.000000e+00> : vector<64x256xf32>
    %26 = tpu.matmul %25, %24, %cst_12 {dimension_numbers = #tpu.dot_dimension_numbers<[1], [0], [0], [1], [0, 0, 1, 1], [], []>, precision = #tpu.contract_precision<fp32>} : vector<64x64xf32>, vector<64x256xf32>, vector<64x256xf32> -> vector<64x256xf32>
    %c0_13 = arith.constant 0 : index
    %c0_14 = arith.constant 0 : index
    %27 = vector.load %arg7[%c0_13, %c0_14] : memref<64x1xf32, #tpu.memory_space<vmem>>, vector<64x1xf32>
    %28 = vector.broadcast %27 : vector<64x1xf32> to vector<64x256xf32>
    %29 = arith.addf %26, %28 : vector<64x256xf32>
    %30 = math.tanh %29 : vector<64x256xf32>
    %c0_15 = arith.constant 0 : index
    %c0_16 = arith.constant 0 : index
    %31 = vector.load %arg8[%c0_15, %c0_16] : memref<64x64xf32, #tpu.memory_space<vmem>>, vector<64x64xf32>
    %cst_17 = arith.constant dense<0.000000e+00> : vector<64x256xf32>
    %32 = tpu.matmul %31, %30, %cst_17 {dimension_numbers = #tpu.dot_dimension_numbers<[1], [0], [0], [1], [0, 0, 1, 1], [], []>, precision = #tpu.contract_precision<fp32>} : vector<64x64xf32>, vector<64x256xf32>, vector<64x256xf32> -> vector<64x256xf32>
    %c0_18 = arith.constant 0 : index
    %c0_19 = arith.constant 0 : index
    %33 = vector.load %arg9[%c0_18, %c0_19] : memref<64x1xf32, #tpu.memory_space<vmem>>, vector<64x1xf32>
    %34 = vector.broadcast %33 : vector<64x1xf32> to vector<64x256xf32>
    %35 = arith.addf %32, %34 : vector<64x256xf32>
    %36 = math.tanh %35 : vector<64x256xf32>
    %c0_20 = arith.constant 0 : index
    %c0_21 = arith.constant 0 : index
    %37 = vector.load %arg10[%c0_20, %c0_21] : memref<1x64xf32, #tpu.memory_space<vmem>>, vector<1x64xf32>
    %cst_22 = arith.constant dense<0.000000e+00> : vector<1x256xf32>
    %38 = tpu.matmul %37, %36, %cst_22 {dimension_numbers = #tpu.dot_dimension_numbers<[1], [0], [0], [1], [0, 0, 1, 1], [], []>, precision = #tpu.contract_precision<fp32>} : vector<1x64xf32>, vector<64x256xf32>, vector<1x256xf32> -> vector<1x256xf32>
    %c0_23 = arith.constant 0 : index
    %c0_24 = arith.constant 0 : index
    %39 = vector.load %arg11[%c0_23, %c0_24] : memref<1x1xf32, #tpu.memory_space<vmem>>, vector<1x1xf32>
    %40 = vector.broadcast %39 : vector<1x1xf32> to vector<1x256xf32>
    %41 = arith.addf %38, %40 : vector<1x256xf32>
    %c0_25 = arith.constant 0 : index
    %c0_26 = arith.constant 0 : index
    %42 = vector.load %arg12[%c0_25, %c0_26] : memref<1x256xf32, #tpu.memory_space<vmem>>, vector<1x256xf32>
    tpu.vector_store %arg12[%c0_25, %c0_26], %41 {strides = array<i32>} : memref<1x256xf32, #tpu.memory_space<vmem>>, vector<1x256xf32>,
    return
  }
  func.func @transform_0(%arg0: i32) -> (i32, i32) {
    %c0_i32 = arith.constant 0 : i32
    %c0_i32_0 = arith.constant 0 : i32
    return %c0_i32, %arg0 : i32, i32
  }
  func.func @transform_1(%arg0: i32) -> (i32, i32) {
    %c0_i32 = arith.constant 0 : i32
    %c0_i32_0 = arith.constant 0 : i32
    %c0_i32_1 = arith.constant 0 : i32
    return %c0_i32, %c0_i32_0 : i32, i32
  }
  func.func @transform_2(%arg0: i32) -> (i32, i32) {
    %c0_i32 = arith.constant 0 : i32
    %c0_i32_0 = arith.constant 0 : i32
    %c0_i32_1 = arith.constant 0 : i32
    return %c0_i32, %c0_i32_0 : i32, i32
  }
  func.func @transform_3(%arg0: i32) -> (i32, i32) {
    %c0_i32 = arith.constant 0 : i32
    %c0_i32_0 = arith.constant 0 : i32
    %c0_i32_1 = arith.constant 0 : i32
    return %c0_i32, %c0_i32_0 : i32, i32
  }
  func.func @transform_4(%arg0: i32) -> (i32, i32) {
    %c0_i32 = arith.constant 0 : i32
    %c0_i32_0 = arith.constant 0 : i32
    %c0_i32_1 = arith.constant 0 : i32
    return %c0_i32, %c0_i32_0 : i32, i32
  }
  func.func @transform_5(%arg0: i32) -> (i32, i32) {
    %c0_i32 = arith.constant 0 : i32
    %c0_i32_0 = arith.constant 0 : i32
    %c0_i32_1 = arith.constant 0 : i32
    return %c0_i32, %c0_i32_0 : i32, i32
  }
  func.func @transform_6(%arg0: i32) -> (i32, i32) {
    %c0_i32 = arith.constant 0 : i32
    %c0_i32_0 = arith.constant 0 : i32
    %c0_i32_1 = arith.constant 0 : i32
    return %c0_i32, %c0_i32_0 : i32, i32
  }
  func.func @transform_7(%arg0: i32) -> (i32, i32) {
    %c0_i32 = arith.constant 0 : i32
    %c0_i32_0 = arith.constant 0 : i32
    %c0_i32_1 = arith.constant 0 : i32
    return %c0_i32, %c0_i32_0 : i32, i32
  }
  func.func @transform_8(%arg0: i32) -> (i32, i32) {
    %c0_i32 = arith.constant 0 : i32
    %c0_i32_0 = arith.constant 0 : i32
    %c0_i32_1 = arith.constant 0 : i32
    return %c0_i32, %c0_i32_0 : i32, i32
  }
  func.func @transform_9(%arg0: i32) -> (i32, i32) {
    %c0_i32 = arith.constant 0 : i32
    %c0_i32_0 = arith.constant 0 : i32
    %c0_i32_1 = arith.constant 0 : i32
    return %c0_i32, %c0_i32_0 : i32, i32
  }
  func.func @transform_10(%arg0: i32) -> (i32, i32) {
    %c0_i32 = arith.constant 0 : i32
    %c0_i32_0 = arith.constant 0 : i32
    %c0_i32_1 = arith.constant 0 : i32
    return %c0_i32, %c0_i32_0 : i32, i32
  }
  func.func @transform_11(%arg0: i32) -> (i32, i32) {
    %c0_i32 = arith.constant 0 : i32
    %c0_i32_0 = arith.constant 0 : i32
    return %c0_i32, %arg0 : i32, i32
  }
}

</mosaic_0001>

<bundles_post_ra>
// kernel: tpu_custom_call.1
= control target key start
LH: loop header
LB: loop body
LE: loop exit
PB: predicated region body
PF: predicated region fallthrough
CT: control target
= control target key end

     0   :  { %s7402_s0 = inlined_call_operand.vmem [shape: f32[2,512], index: 0, kind: input, shape index: {}]   ;;  %s7403_s1 = inlined_call_operand.vmem [shape: f32[64,2], index: 1, kind: input, shape index: {}]   ;;  %s7404_s2 = inlined_call_operand.vmem [shape: f32[64,1], index: 2, kind: input, shape index: {}]   ;;  %s7405_s3 = inlined_call_operand.vmem [shape: f32[64,64], index: 3, kind: input, shape index: {}]   ;;  %s7406_s4 = inlined_call_operand.vmem [shape: f32[64,1], index: 4, kind: input, shape index: {}]   ;;  %s7407_s5 = inlined_call_operand.vmem [shape: f32[64,64], index: 5, kind: input, shape index: {}]   ;;  %s7408_s6 = inlined_call_operand.vmem [shape: f32[64,1], index: 6, kind: input, shape index: {}]   ;;  %s7409_s7 = inlined_call_operand.vmem [shape: f32[64,64], index: 7, kind: input, shape index: {}]   ;;  %s7410_s8 = inlined_call_operand.vmem [shape: f32[64,1], index: 8, kind: input, shape index: {}]   ;;  %s7411_s9 = inlined_call_operand.vmem [shape: f32[1,64], index: 9, kind: input, shape index: {}]   ;;  %s7412_s10 = inlined_call_operand.<no memory space> [shape: f32[1,1], index: 10, kind: input, shape index: {}]   ;;  %s7413_s11 = inlined_call_operand.hbm [shape: f32[1,512], index: 11, kind: output, shape index: {}]  }
   0x1   :  { %v16_v0 = vstv %s7412_s10 }
   0x2   :  { %17 = vst [vmem:[#allocation2] sm:$0x1] %v16_v0 }
   0x3   :  { %18 = vsyncpa [#allocation4], 0 }
   0x4   :  { %20 = vsyncpa [#allocation4 + $0x1], 0  ;;  %s5687_s19 = smov 0   ;;  %s5689_s20 = smov 0  }
   0x5   :  { %s5691_s21 = smov 0   ;;  %s5693_s22 = smov 0  }
   0x6 LB: > { %s5708_s10 = sadd.s32 4294967295, %s5617_s22   ;;  %s4669_s23 = sadd.s32 4294967294, %s5617_s22   ;;  %s5617_s22 = sphi %s5693_s22, %s7479_s22   ;;  %s5613_s21 = sphi %s5691_s21, %s7478_s21   ;;  %s5609_s20 = sphi %s5689_s20, %s7477_s20   ;;  %s5605_s19 = sphi %s5687_s19, %s7476_s19  }
   0x7   : > { %s5712_s24 = sadd.s32 1, %s5617_s22   ;;  %s269_s25 = sadd.s32 1, %s5613_s21 }
   0x8   : > { %s266_s26 = ssub.s32 %s5617_s22, %s5712_s24  ;;  %p279_p0 = scmp.ne.s32.totalorder %s5613_s21, %s5609_s20 }
   0x9   : > { %p267_p1 = scmp.eq.s32.totalorder %s266_s26, 0  ;;  %p280_p2 = scmp.eq.s32.totalorder %s5708_s10, 1 }
   0xa   : > { %p285_p3 = scmp.ne.s32.totalorder %s5609_s20, %s5605_s19  ;;  %p286_p4 = scmp.eq.s32.totalorder %s4669_s23, 1 }
   0xb   : > { %s5723_s27 = scalar_select %p267_p1, %s5613_s21, %s269_s25  }
   0xc   : > { %p5725_p5 = por %p280_p2, %p279_p0  ;;  %p5729_p6 = por %p286_p4, %p285_p3 }
   0xd   : > { %p4672_p7 = scmp.ge.s32.totalorder %s5617_s22, 1  ;;  %p343_p8 = scmp.lt.s32.totalorder %s5617_s22, 3 }
   0xf   : > { %p344_p9 = pnand %p4672_p7, %p343_p8 }
  0x11   : > { %347 = sbr.rel (%p344_p9) target bundleno = 1784 (0x6f8), region = 64 }
  0x18   : > { %v393_v1 = vld [vmem:[%s7403_s1 + $0x10] sm:$0xff]  ;;  %v391_v2 = vld [vmem:[%s7403_s1] sm:$0xff]  ;;  %v5619_v3 = vmov 1   ;;  %v392_v5 = vld [vmem:[%s7403_s1 + $0x8] sm:$0xff]  ;;  %v5620_v8 = vmov 0   ;;  %v7419_v37 = vmov 0.0   ;;  %v7414_v45 = vlaneseq }
  0x19   : > { %5419 = vset.pattern.permute.xlu0 %v5619_v3  ;;  %5417 = vset.pattern.permute.xlu1 %v5619_v3  ;;  %v395_v4 = vld [vmem:[%s7403_s1 + $0x20] sm:$0xff]  ;;  %v397_v6 = vld [vmem:[%s7403_s1 + $0x30] sm:$0xff]  ;;  %v394_v7 = vld [vmem:[%s7403_s1 + $0x18] sm:$0xff]  ;;  %s4674_s14 = sshll.u32 %s5708_s10, 1  ;;  %vm708_vm0 = vcmask 523264   ;;  %s4681_s16 = sshll.u32 %s5708_s10, 5 }
  0x1a   : > { %499 = vperm.xlu0 %5419, %v393_v1   ;;  %491 = vperm.xlu1 %5417, %v391_v2   ;;  %v572_v9 = vld [vmem:[%s7404_s2] sm:$0xff]  ;;  %v573_v10 = vld [vmem:[%s7404_s2 + $0x8] sm:$0xff]  ;;  %v575_v12 = vld [vmem:[%s7404_s2 + $0x18] sm:$0xff]  ;;  %p384_p10 = scmp.lt.s32.totalorder %s4674_s14, 3  ;;  %v5859_v46 = vshrl.u32 %v7414_v45, 7  ;;  %s7360_s26 = scalar_lea.hbm %s7413_s11, %s4681_s16 }
  0x1b   : > { %v396_v11 = vld [vmem:[%s7403_s1 + $0x28] sm:$0xff]  ;;  %v660_v14 = vld [vmem:[%s7406_s4] sm:$0xff]  ;;  %v574_v15 = vld [vmem:[%s7404_s2 + $0x10] sm:$0xff]  ;;  %813 = vmatprep.mubr.f32.mxu1 %v7419_v37  ;;  %1046 = vmatprep.mubr.f32.mxu0 %v7419_v37  ;;  %s5623_s10 = smov [#allocation3]  }
  0x1c   : > { %v577_v13 = vld [vmem:[%s7404_s2 + $0x28] sm:$0xff]  ;;  %v662_v16 = vld [vmem:[%s7406_s4 + $0x10] sm:$0xff]  ;;  %v664_v17 = vld [vmem:[%s7406_s4 + $0x20] sm:$0xff]  ;;  %s7481_s14 = smov (!%p384_p10, %s4674_s14), 3  ;;  %7428 = vst [vmem:[#allocation6_spill] sm:$0xff] %v5859_v46  ;;  %v524_v49 = vsub.s32 1, %v5859_v46 }
  0x1d   : > { %v398_v18 = vld [vmem:[%s7403_s1 + $0x38] sm:$0xff]  ;;  %v666_v19 = vld [vmem:[%s7406_s4 + $0x30] sm:$0xff]  ;;  %v1747_v20 = vld [vmem:[%s7408_s6] sm:$0xff]  ;;  %s4675_s15 = sshll.u32 %s7481_s14, 1  ;;  %v528_v50 = vsub.s32 3, %v5859_v46  ;;  %v5869_v53 = vsub.s32 0, %v5859_v46 }
  0x1e   : > { %507 = vperm.xlu0 %5419, %v395_v4   ;;  %495 = vperm.xlu1 %5417, %v392_v5   ;;  %v576_v21 = vld [vmem:[%s7404_s2 + $0x20] sm:$0xff]  ;;  %v1749_v22 = vld [vmem:[%s7408_s6 + $0x10] sm:$0xff]  ;;  %v579_v25 = vld [vmem:[%s7404_s2 + $0x38] sm:$0xff]  ;;  %s387_s18 = scalar_lea.vmem %s7402_s0, %s4675_s15  ;;  %v446_v54 = vsub.s32 2, %v5859_v46  ;;  %s380_s14 = sand.u32 1, %s5609_s20  }
  0x1f   : > { %v578_v23 = vld [vmem:[%s7404_s2 + $0x30] sm:$0xff]  ;;  %v1751_v24 = vld [vmem:[%s7408_s6 + $0x20] sm:$0xff]  ;;  %v661_v27 = vld [vmem:[%s7406_s4 + $0x8] sm:$0xff]  ;;  %7429 = vst [vmem:[#allocation7_spill] sm:$0xff] %v5869_v53  ;;  %s4673_s15 = sshll.u32 %s380_s14, 1  ;;  %s4596_s30 = scalar_lea.sflag [#allocation4], %s380_s14 }
  0x20   : > { %v1753_v26 = vld [vmem:[%s7408_s6 + $0x30] sm:$0xff]  ;;  %v2833_v28 = vld [vmem:[%s7410_s8] sm:$0xff]  ;;  %v663_v29 = vld [vmem:[%s7406_s4 + $0x18] sm:$0xff]  ;;  %s382_s17 = scalar_lea.vmem [#allocation3], %s4673_s15  ;;  %s5559_s13 = sshll.u32 %s5623_s10, 4  ;;  %s5560_s13 = int_to_ptr.vmem [resolvable:$false] %s5559_s13 }
  0x21   : > { %v2836_v30 = vld [vmem:[%s7410_s8 + $0x18] sm:$0xff]  ;;  %v665_v31 = vld [vmem:[%s7406_s4 + $0x28] sm:$0xff]  ;;  %v2837_v32 = vld [vmem:[%s7410_s8 + $0x20] sm:$0xff]  ;;  %s5561_s15 = scalar_lea.vmem %s5560_s13, 64 }
  0x22   : > { %515 = vperm.xlu0 %5419, %v397_v6   ;;  %5418 = vset.pattern.permute.xlu1 %v5620_v8  ;;  %v667_v33 = vld [vmem:[%s7406_s4 + $0x38] sm:$0xff]  ;;  %v2839_v34 = vld [vmem:[%s7410_s8 + $0x30] sm:$0xff]  ;;  %v1748_v35 = vld [vmem:[%s7408_s6 + $0x8] sm:$0xff] }
  0x23   : > { %416 = vperm.xlu1 %5418, %v394_v7   ;;  %v3912_v36 = vld [vmem:[#allocation2] sm:$0x1]  ;;  %v1750_v38 = vld [vmem:[%s7408_s6 + $0x18] sm:$0xff]  ;;  %v1752_v39 = vld [vmem:[%s7408_s6 + $0x28] sm:$0xff] }
  0x24   : > { %v1754_v40 = vld [vmem:[%s7408_s6 + $0x38] sm:$0xff]  ;;  %v2834_v41 = vld [vmem:[%s7410_s8 + $0x8] sm:$0xff]  ;;  %v2835_v42 = vld [vmem:[%s7410_s8 + $0x10] sm:$0xff] }
  0x25   : > { %v2838_v43 = vld [vmem:[%s7410_s8 + $0x28] sm:$0xff]  ;;  %v2840_v44 = vld [vmem:[%s7410_s8 + $0x38] sm:$0xff]  ;;  %v390_v55 = vld [vmem:[%s387_s18] sm:$0xf]  ;;  %s4610_s18 = sshll.u32 %s382_s17, 4  ;;  %s7362_s18 = int_to_ptr.vmem [resolvable:$true] %s4610_s18 }
  0x26   : > { %5424 = vset.pattern.permute.xlu0 %v5620_v8  ;;  %v525_v56 = vrot.slane %v390_v55, %v524_v49  ;;  %v529_v57 = vrot.slane %v390_v55, %v528_v50  ;;  %v443_v59 = vrot.slane %v390_v55, %v5869_v53  ;;  %v447_v60 = vrot.slane %v390_v55, %v446_v54  ;;  %s5555_s12 = scalar_lea.vmem %s7362_s18, 32  ;;  %p5562_p0 = scmp.lt.s32.totalorder %s7362_s18, %s5560_s13 }
  0x27   : > { %401 = vperm.xlu0 %5424, %v391_v2   ;;  %5420 = vset.pattern.permute.xlu1 %v5619_v3  ;;  %p5556_p11 = scmp.ne.s32.totalorder %s7362_s18, %s5555_s12  ;;  %p5563_p1 = scmp.lt.s32.totalorder %s5561_s15, %s5555_s12 }
  0x28   : > { %503 = vperm.xlu1 %5420, %v394_v7   ;;  %v5875_v62 = vrot.slane %v525_v56, %v524_v49  ;;  %v5877_v63 = vrot.slane %v529_v57, %v524_v49  ;;  %v5880_v0 = vrot.slane %v443_v59, %v5869_v53 }
  0x29   : > { %p5557_p12 = pnand %p5556_p11, %p5725_p5  ;;  %p5564_p2 = por %p5563_p1, %p5562_p0 }
  0x2b   : > { %406 = vperm.xlu0 %5424, %v392_v5   ;;  %p5558_p13 = pneg %p5557_p12 }
  0x2c   : > { %5421 = vset.pattern.permute.xlu1 %v5620_v8 }
  0x2d   : > { %582 = vperm.xlu1 %5421, %v572_v9   ;;  %p5565_p3 = pnand %p5564_p2, %p5558_p13 }
  0x2f   : > { %411 = vperm.xlu0 %5424, %v393_v1   ;;  %v5883_v1 = vrot.slane %v447_v60, %v5869_v53 }
  0x31   : > { %421 = vperm.xlu1 %5421, %v395_v4  }
  0x33   : > { %587 = vperm.xlu0 %5424, %v573_v10  }
  0x35   : > { %426 = vperm.xlu1 %5421, %v396_v11  }
  0x37   : > { %597 = vperm.xlu0 %5424, %v575_v12  }
  0x39   : > { %5422 = vset.pattern.permute.xlu1 %v5619_v3 }
  0x3a   : > { %511 = vperm.xlu1 %5422, %v396_v11  }
  0x3b   : > { %607 = vperm.xlu0 %5424, %v577_v13  }
  0x3e   : > { %5423 = vset.pattern.permute.xlu1 %v5620_v8 }
  0x3f   : > { %670 = vperm.xlu0 %5424, %v660_v14   ;;  %592 = vperm.xlu1 %5423, %v574_v15  }
  0x43   : > { %680 = vperm.xlu0 %5424, %v662_v16   ;;  %431 = vperm.xlu1 %5423, %v397_v6  }
  0x47   : > { %690 = vperm.xlu0 %5424, %v664_v17   ;;  %436 = vperm.xlu1 %5423, %v398_v18  }
  0x4b   : > { %700 = vperm.xlu0 %5424, %v666_v19   ;;  %5425 = vset.pattern.permute.xlu1 %v5619_v3 }
  0x4c   : > { %519 = vperm.xlu1 %5425, %v398_v18  }
  0x4f   : > { %1757 = vperm.xlu0 %5424, %v1747_v20  }
  0x50   : > { %5426 = vset.pattern.permute.xlu1 %v5620_v8 }
  0x51   : > { %602 = vperm.xlu1 %5426, %v576_v21  }
  0x53   : > { %1767 = vperm.xlu0 %5424, %v1749_v22  }
  0x55   : > { %612 = vperm.xlu1 %5426, %v578_v23  }
  0x57   : > { %1777 = vperm.xlu0 %5424, %v1751_v24  }
  0x59   : > { %617 = vperm.xlu1 %5426, %v579_v25  }
  0x5b   : > { %1787 = vperm.xlu0 %5424, %v1753_v26  }
  0x5d   : > { %675 = vperm.xlu1 %5426, %v661_v27  }
  0x5f   : > { %2843 = vperm.xlu0 %5424, %v2833_v28  }
  0x61   : > { %685 = vperm.xlu1 %5426, %v663_v29  }
  0x63   : > { %2858 = vperm.xlu0 %5424, %v2836_v30  }
  0x65   : > { %695 = vperm.xlu1 %5426, %v665_v31  }
  0x67   : > { %2863 = vperm.xlu0 %5424, %v2837_v32  }
  0x69   : > { %705 = vperm.xlu1 %5426, %v667_v33  }
  0x6b   : > { %2873 = vperm.xlu0 %5424, %v2839_v34  }
  0x6d   : > { %1762 = vperm.xlu1 %5426, %v1748_v35  }
  0x6f   : > { %3915 = vperm.xlu0 %5424, %v3912_v36  }
  0x71   : > { %1772 = vperm.xlu1 %5426, %v1750_v38  }
  0x75   : > { %1782 = vperm.xlu1 %5426, %v1752_v39  }
  0x79   : > { %1792 = vperm.xlu1 %5426, %v1754_v40  }
  0x7d   : > { %2848 = vperm.xlu1 %5426, %v2834_v41  }
  0x81   : > { %2853 = vperm.xlu1 %5426, %v2835_v42  }
  0x85   : > { %2868 = vperm.xlu1 %5426, %v2838_v43  }
  0x89   : > { %2878 = vperm.xlu1 %5426, %v2840_v44  }
  0x99   : > { %v492_v47 = vpop.permute.xlu1 %491  ;;  %v500_v48 = vpop.permute.xlu0 %499 }
  0x9a   : > { %v540_v6 = vmul.f32 %v5875_v62, %v492_v47  ;;  %v541_v7 = vmul.f32 %v5877_v63, %v492_v47  ;;  %v544_v35 = vmul.f32 %v5875_v62, %v500_v48  ;;  %v545_v38 = vmul.f32 %v5877_v63, %v500_v48 }
  0x9d   : > { %v496_v51 = vpop.permute.xlu1 %495  ;;  %v5866_v52 = vpop.permute.xlu0 %507 }
  0x9e   : > { %v542_v17 = vmul.f32 %v5875_v62, %v496_v51  ;;  %v543_v18 = vmul.f32 %v5877_v63, %v496_v51 }
  0xa1   : > { %v5872_v58 = vpop.permute.xlu0 %515 }
  0xa2   : > { %v417_v61 = vpop.permute.xlu1 %416 }
  0xa3   : > { %v464_v25 = vmul.f32 %v5880_v0, %v417_v61  ;;  %v465_v26 = vmul.f32 %v5883_v1, %v417_v61 }
  0xa6   : > { %v402_v2 = vpop.permute.xlu0 %401 }
  0xa7   : > { %v458_v3 = vmul.f32 %v5880_v0, %v402_v2  ;;  %v459_v4 = vmul.f32 %v5883_v1, %v402_v2  ;;  %v504_v5 = vpop.permute.xlu1 %503 }
  0xa8   : > { %v546_v20 = vmul.f32 %v5875_v62, %v504_v5  ;;  %v547_v21 = vmul.f32 %v5877_v63, %v504_v5 }
  0xa9   : > { %v556_v9 = vadd.f32 %v540_v6, %v458_v3  ;;  %v557_v10 = vadd.f32 %v541_v7, %v459_v4 }
  0xaa   : > { %v407_v8 = vpop.permute.xlu0 %406  ;;  %v562_v30 = vadd.f32 %v546_v20, %v464_v25  ;;  %v563_v31 = vadd.f32 %v547_v21, %v465_v26 }
  0xab   : > { %v460_v12 = vmul.f32 %v5880_v0, %v407_v8  ;;  %v461_v13 = vmul.f32 %v5883_v1, %v407_v8 }
  0xac   : > { %v583_v11 = vpop.permute.xlu1 %582 }
  0xad   : > { %v620_v14 = vadd.f32 %v583_v11, %v556_v9  ;;  %v621_v15 = vadd.f32 %v583_v11, %v557_v10  ;;  %v558_v22 = vadd.f32 %v542_v17, %v460_v12  ;;  %v559_v23 = vadd.f32 %v543_v18, %v461_v13 }
  0xae   : > { %v412_v16 = vpop.permute.xlu0 %411 }
  0xaf   : > { %5427 = vtanh.f32 %v620_v14  ;;  %v462_v39 = vmul.f32 %v5880_v0, %v412_v16  ;;  %v463_v40 = vmul.f32 %v5883_v1, %v412_v16 }
  0xb0   : > { %5429 = vtanh.f32 %v621_v15  ;;  %v5893_v19 = vpop.permute.xlu1 %421 }
  0xb1   : > { %v560_v50 = vadd.f32 %v544_v35, %v462_v39  ;;  %v561_v51 = vadd.f32 %v545_v38, %v463_v40 }
  0xb2   : > { %v588_v24 = vpop.permute.xlu0 %587 }
  0xb3   : > { %v622_v27 = vadd.f32 %v588_v24, %v558_v22  ;;  %v623_v28 = vadd.f32 %v588_v24, %v559_v23 }
  0xb4   : > { %v427_v29 = vpop.permute.xlu1 %426 }
  0xb5   : > { %5431 = vtanh.f32 %v622_v27  ;;  %v468_v48 = vmul.f32 %v5880_v0, %v427_v29  ;;  %v469_v59 = vmul.f32 %v5883_v1, %v427_v29 }
  0xb6   : > { %5433 = vtanh.f32 %v623_v28  ;;  %v598_v32 = vpop.permute.xlu0 %597  ;;  %v652_v28 = vld [vmem:[%s7405_s3] sm:$0xff] }
  0xb7   : > { %v626_v33 = vadd.f32 %v598_v32, %v562_v30  ;;  %v627_v34 = vadd.f32 %v598_v32, %v563_v31  ;;  %v5941_v35 = vsel %vm708_vm0, %v652_v28, 0 }
  0xb9   : > { %v5428_v36 = vpop.eup %5427  ;;  %5435 = vtanh.f32 %v626_v33  ;;  %v512_v41 = vpop.permute.xlu1 %511 }
  0xba   : > { %v5430_v42 = vpop.eup %5429  ;;  %5437 = vtanh.f32 %v627_v34  ;;  %v735_v43 = vand.u32 4294901760, %v5428_v36  ;;  %v550_v47 = vmul.f32 %v5875_v62, %v512_v41  ;;  %v551_v49 = vmul.f32 %v5877_v63, %v512_v41  ;;  %v608_v13 = vpop.permute.xlu0 %607  ;;  %v653_v41 = vld [vmem:[%s7405_s3 + $0x8] sm:$0xff] }
  0xbb   : > { %v733_v44 = vand.u32 4294901760, %v5430_v42 }
  0xbc   : > { %v5905_v54 = vsub.f32 %v5428_v36, %v735_v43  ;;  %v566_v3 = vadd.f32 %v550_v47, %v468_v48  ;;  %v567_v5 = vadd.f32 %v551_v49, %v469_v59  ;;  %v548_v36 = vmul.f32 %v5875_v62, %v5866_v52 }
  0xbd   : > { %v5908_v56 = vsub.f32 %v5430_v42, %v733_v44  ;;  %v549_v42 = vmul.f32 %v5877_v63, %v5866_v52  ;;  %v5960_v52 = vand.u32 4294901760, %v5941_v35 }
  0xbe   : > { %v593_v55 = vpop.permute.xlu1 %592  ;;  %v910_v7 = vand.u32 4294901760, %v5905_v54  ;;  %v630_v16 = vadd.f32 %v608_v13, %v566_v3  ;;  %v631_v20 = vadd.f32 %v608_v13, %v567_v5 }
  0xbf   : > { %v5432_v57 = vpop.eup %5431  ;;  %v624_v60 = vadd.f32 %v593_v55, %v560_v50  ;;  %v625_v61 = vadd.f32 %v593_v55, %v561_v51  ;;  %v904_v11 = vand.u32 4294901760, %v5908_v56 }
  0xc0   : > { %v5434_v2 = vpop.eup %5433  ;;  %v739_v4 = vand.u32 4294901760, %v5432_v57  ;;  %v911_v21 = vsub.f32 %v5905_v54, %v910_v7 }
  0xc1   : > { %v737_v6 = vand.u32 4294901760, %v5434_v2  ;;  %5439 = vtanh.f32 %v624_v60  ;;  %v905_v24 = vsub.f32 %v5908_v56, %v904_v11 }
  0xc2   : > { %v432_v8 = vpop.permute.xlu1 %431  ;;  %v5912_v9 = vpack.c.bf16 %v739_v4, %v735_v43  ;;  %v5914_v10 = vsub.f32 %v5432_v57, %v739_v4  ;;  %5441 = vtanh.f32 %v625_v61  ;;  %v912_v33 = vand.u32 4294901760, %v911_v21 }
  0xc3   : > { %v5436_v12 = vpop.eup %5435  ;;  %v5917_v14 = vpack.c.bf16 %v737_v6, %v733_v44  ;;  %v5919_v17 = vsub.f32 %v5434_v2, %v737_v6  ;;  %5443 = vtanh.f32 %v630_v16  ;;  %v906_v38 = vand.u32 4294901760, %v905_v24 }
  0xc4   : > { %v5438_v15 = vpop.eup %5437  ;;  %v922_v18 = vand.u32 4294901760, %v5914_v10  ;;  %v747_v22 = vand.u32 4294901760, %v5436_v12  ;;  %5445 = vtanh.f32 %v631_v20  ;;  %v466_v43 = vmul.f32 %v5880_v0, %v5893_v19 }
  0xc5   : > { %4683 = vmatprep.subr.bf16.mxu1 %v5917_v14  ;;  %v916_v25 = vand.u32 4294901760, %v5919_v17  ;;  %v745_v27 = vand.u32 4294901760, %v5438_v15  ;;  %v467_v44 = vmul.f32 %v5883_v1, %v5893_v19  ;;  %v470_v51 = vmul.f32 %v5880_v0, %v432_v8 }
  0xc6   : > { %4685 = vmatpush1.bf16.msra.mxu1 %v5912_v9  ;;  %v5925_v23 = vpop.permute.xlu1 %436  ;;  %v923_v26 = vsub.f32 %v5914_v10, %v922_v18  ;;  %v5933_v29 = vpack.c.bf16 %v922_v18, %v910_v7  ;;  %v5938_v34 = vsub.f32 %v5436_v12, %v747_v22  ;;  %v471_v48 = vmul.f32 %v5883_v1, %v432_v8 }
  0xc7   : > { %v917_v30 = vsub.f32 %v5919_v17, %v916_v25  ;;  %v5936_v32 = vpack.c.bf16 %v916_v25, %v904_v11  ;;  %v5945_v40 = vsub.f32 %v5438_v15, %v745_v27  ;;  %v5963_v61 = vsel %vm708_vm0, %v653_v41, 0 }
  0xc8   : > { %v924_v31 = vand.u32 4294901760, %v923_v26  ;;  %v946_v60 = vand.u32 4294901760, %v5938_v34  ;;  %v552_v19 = vmul.f32 %v5875_v62, %v5872_v58  ;;  %v553_v2 = vmul.f32 %v5877_v63, %v5872_v58 }
  0xc9   : > { %v918_v39 = vand.u32 4294901760, %v917_v30  ;;  %v940_v4 = vand.u32 4294901760, %v5945_v40  ;;  %v564_v5 = vadd.f32 %v548_v36, %v466_v43  ;;  %v565_v6 = vadd.f32 %v549_v42, %v467_v44 }
  0xca   : > { %v4700_v49 = vpack.c.bf16 %v924_v31, %v912_v33  ;;  %v568_v15 = vadd.f32 %v552_v19, %v470_v51  ;;  %v569_v16 = vadd.f32 %v553_v2, %v471_v48  ;;  %v947_v21 = vsub.f32 %v5938_v34, %v946_v60 }
  0xcb   : > { %v520_v47 = vpop.permute.xlu1 %519  ;;  %v5440_v50 = vpop.eup %5439  ;;  %v4698_v55 = vpack.c.bf16 %v918_v39, %v906_v38  ;;  %v6006_v2 = vand.u32 4294901760, %v5963_v61 }
  0xcc   : > { %v5442_v57 = vpop.eup %5441  ;;  %v743_v59 = vand.u32 4294901760, %v5440_v50  ;;  %v554_v25 = vmul.f32 %v5875_v62, %v520_v47  ;;  %v555_v30 = vmul.f32 %v5877_v63, %v520_v47  ;;  %v948_v63 = vand.u32 4294901760, %v947_v21 }
  0xcd   : > { %4699 = vmatprep.subr.bf16.mxu0 %v4698_v55  ;;  %v741_v3 = vand.u32 4294901760, %v5442_v57  ;;  %v5444_v24 = vpop.eup %5443 }
  0xce   : > { %4701 = vmatpush1.bf16.msra.mxu0 %v4700_v49  ;;  %v5970_v7 = vpack.c.bf16 %v747_v22, %v743_v59  ;;  %v5972_v8 = vsub.f32 %v5440_v50, %v743_v59  ;;  %v472_v22 = vmul.f32 %v5880_v0, %v5925_v23  ;;  %v5446_v28 = vpop.eup %5445  ;;  %v473_v0 = vmul.f32 %v5883_v1, %v5925_v23 }
  0xcf   : > { %v5974_v12 = vpack.c.bf16 %v745_v27, %v741_v3  ;;  %v5976_v13 = vsub.f32 %v5442_v57, %v741_v3  ;;  %v941_v27 = vsub.f32 %v5945_v40, %v940_v4  ;;  %v753_v47 = vand.u32 4294901760, %v5446_v28 }
  0xd0   : > { %v603_v11 = vpop.permute.xlu1 %602  ;;  %v934_v20 = vand.u32 4294901760, %v5972_v8  ;;  %v755_v49 = vand.u32 4294901760, %v5444_v24  ;;  %v570_v50 = vadd.f32 %v554_v25, %v472_v22  ;;  %v571_v51 = vadd.f32 %v555_v30, %v473_v0 }
  0xd1   : > { %v628_v18 = vadd.f32 %v603_v11, %v564_v5  ;;  %v629_v58 = vadd.f32 %v603_v11, %v565_v6  ;;  %4687 = vmatprep.subr.bf16.mxu1 %v5974_v12  ;;  %v928_v26 = vand.u32 4294901760, %v5976_v13  ;;  %v942_v44 = vand.u32 4294901760, %v941_v27 }
  0xd2   : > { %4689 = vmatpush1.bf16.msra.mxu1 %v5970_v7  ;;  %v935_v31 = vsub.f32 %v5972_v8, %v934_v20  ;;  %v5989_v33 = vpack.c.bf16 %v946_v60, %v934_v20  ;;  %v5998_v59 = vsub.f32 %v5941_v35, %v5960_v52  ;;  %v654_v60 = vld [vmem:[%s7405_s3 + $0x10] sm:$0xff]  ;;  %v6003_v19 = vsub.f32 %v5444_v24, %v755_v49 }
  0xd3   : > { %5447 = vtanh.f32 %v628_v18  ;;  %v929_v36 = vsub.f32 %v5976_v13, %v928_v26  ;;  %v5994_v38 = vpack.c.bf16 %v940_v4, %v928_v26  ;;  %v6008_v3 = vsub.f32 %v5446_v28, %v753_v47  ;;  %v655_v18 = vld [vmem:[%s7405_s3 + $0x18] sm:$0xff] }
  0xd4   : > { %5449 = vtanh.f32 %v629_v58  ;;  %v613_v62 = vpop.permute.xlu1 %612  ;;  %v936_v42 = vand.u32 4294901760, %v935_v31  ;;  %v716_v4 = vsel %vm708_vm0, %v654_v60, 0  ;;  %v7416_v35 = vand.u32 4294901760, %v5998_v59 }
  0xd5   : > { %v632_v39 = vadd.f32 %v613_v62, %v568_v15  ;;  %v633_v41 = vadd.f32 %v613_v62, %v569_v16  ;;  %v930_v43 = vand.u32 4294901760, %v929_v36  ;;  %v970_v15 = vand.u32 4294901760, %v6003_v19 }
  0xd6   : > { %v4704_v48 = vpack.c.bf16 %v948_v63, %v936_v42  ;;  %v6015_v16 = vsub.f32 %v5963_v61, %v6006_v2  ;;  %v964_v20 = vand.u32 4294901760, %v6008_v3  ;;  %v6021_v21 = vand.u32 4294901760, %v716_v4 }
  0xd7   : > { %5451 = vtanh.f32 %v632_v39  ;;  %v4702_v23 = vpack.c.bf16 %v942_v44, %v930_v43  ;;  %v6034_v61 = vsub.f32 %v5998_v59, %v7416_v35  ;;  %v719_v28 = vsel %vm708_vm0, %v655_v18, 0  ;;  %v656_v39 = vld [vmem:[%s7405_s3 + $0x20] sm:$0xff] }
  0xd8   : > { %5453 = vtanh.f32 %v633_v41  ;;  %v618_v1 = vpop.permute.xlu1 %617  ;;  %v971_v62 = vsub.f32 %v6003_v19, %v970_v15  ;;  %v7415_v36 = vand.u32 4294901760, %v6015_v16  ;;  %v965_v63 = vsub.f32 %v6008_v3, %v964_v20 }
  0xd9   : > { %v634_v55 = vadd.f32 %v618_v1, %v570_v50  ;;  %v635_v57 = vadd.f32 %v618_v1, %v571_v51  ;;  %4703 = vmatprep.subr.bf16.mxu0 %v4702_v23  ;;  %v6047_v43 = vsub.f32 %v716_v4, %v6021_v21  ;;  %v722_v23 = vsel %vm708_vm0, %v656_v39, 0 }
  0xda   : > { %4705 = vmatpush1.bf16.msra.mxu0 %v4704_v48 }
  0xdb   : > { %5455 = vtanh.f32 %v634_v55 }
  0xdc   : > { %5457 = vtanh.f32 %v635_v57 }
  0xdd   : > { %v5448_v5 = vpop.eup %5447 }
  0xde   : > { %v5450_v6 = vpop.eup %5449  ;;  %v751_v11 = vand.u32 4294901760, %v5448_v5 }
  0xdf   : > { %v749_v58 = vand.u32 4294901760, %v5450_v6 }
  0xe0   : > { %v6023_v24 = vpack.c.bf16 %v755_v49, %v751_v11  ;;  %v6025_v22 = vsub.f32 %v5448_v5, %v751_v11  ;;  %v6053_v49 = vand.u32 4294901760, %v719_v28  ;;  %v972_v5 = vand.u32 4294901760, %v971_v62 }
  0xe1   : > { %v5452_v25 = vpop.eup %5451  ;;  %v6027_v26 = vpack.c.bf16 %v753_v47, %v749_v58  ;;  %v6029_v27 = vsub.f32 %v5450_v6, %v749_v58  ;;  %v966_v58 = vand.u32 4294901760, %v965_v63  ;;  %v828_v62 = vsub.f32 %v6015_v16, %v7415_v36 }
  0xe2   : > { %v5454_v30 = vpop.eup %5453  ;;  %v759_v31 = vand.u32 4294901760, %v5452_v25  ;;  %v958_v0 = vand.u32 4294901760, %v6025_v22 }
  0xe3   : > { %4691 = vmatprep.subr.bf16.mxu1 %v6027_v26  ;;  %v757_v41 = vand.u32 4294901760, %v5454_v30  ;;  %v952_v42 = vand.u32 4294901760, %v6029_v27 }
  0xe4   : > { %4693 = vmatpush1.bf16.msra.mxu1 %v6023_v24  ;;  %v6050_v44 = vsub.f32 %v5452_v25, %v759_v31  ;;  %v959_v47 = vsub.f32 %v6025_v22, %v958_v0  ;;  %v6055_v50 = vpack.c.bf16 %v970_v15, %v958_v0 }
  0xe5   : > { %v5456_v51 = vpop.eup %5455  ;;  %v6057_v48 = vsub.f32 %v5454_v30, %v757_v41  ;;  %v953_v1 = vsub.f32 %v6029_v27, %v952_v42  ;;  %v6061_v55 = vpack.c.bf16 %v964_v20, %v952_v42  ;;  %v657_v42 = vld [vmem:[%s7405_s3 + $0x28] sm:$0xff] }
  0xe6   : > { %v5458_v57 = vpop.eup %5457  ;;  %v763_v60 = vand.u32 4294901760, %v5456_v51  ;;  %v960_v4 = vand.u32 4294901760, %v959_v47  ;;  %v982_v6 = vand.u32 4294901760, %v6050_v44  ;;  %v6082_v47 = vsub.f32 %v719_v28, %v6053_v49 }
  0xe7   : > { %v761_v11 = vand.u32 4294901760, %v5458_v57  ;;  %v954_v18 = vand.u32 4294901760, %v953_v1  ;;  %v976_v15 = vand.u32 4294901760, %v6057_v48  ;;  %v725_v28 = vsel %vm708_vm0, %v657_v42, 0 }
  0xe8   : > { %v6065_v25 = vpack.c.bf16 %v763_v60, %v759_v31  ;;  %v6067_v30 = vsub.f32 %v5456_v51, %v763_v60  ;;  %v4708_v0 = vpack.c.bf16 %v972_v5, %v960_v4  ;;  %v983_v63 = vsub.f32 %v6050_v44, %v982_v6 }
  0xe9   : > { %v6069_v45 = vpack.c.bf16 %v761_v11, %v757_v41  ;;  %v6071_v20 = vsub.f32 %v5458_v57, %v761_v11  ;;  %v4706_v39 = vpack.c.bf16 %v966_v58, %v954_v18  ;;  %v6084_v41 = vand.u32 4294901760, %v722_v23 }
  0xea   : > { %v994_v31 = vand.u32 4294901760, %v6067_v30  ;;  %v818_v51 = vand.u32 4294901760, %v6034_v61  ;;  %v977_v1 = vsub.f32 %v6057_v48, %v976_v15  ;;  %v838_v60 = vand.u32 4294901760, %v6047_v43  ;;  %v658_v61 = vld [vmem:[%s7405_s3 + $0x30] sm:$0xff] }
  0xeb   : > { %4695 = vmatprep.subr.bf16.mxu1 %v6069_v45  ;;  %4707 = vmatprep.subr.bf16.mxu0 %v4706_v39  ;;  %v988_v57 = vand.u32 4294901760, %v6071_v20  ;;  %v829_v11 = vand.u32 4294901760, %v828_v62  ;;  %v984_v39 = vand.u32 4294901760, %v983_v63  ;;  %v849_v35 = vand.u32 4294901760, %v6082_v47 }
  0xec   : > { %4697 = vmatpush1.bf16.msra.mxu1 %v6065_v25  ;;  %4709 = vmatpush1.bf16.msra.mxu0 %v4708_v0  ;;  %v995_v4 = vsub.f32 %v6067_v30, %v994_v31  ;;  %v6094_v5 = vpack.c.bf16 %v994_v31, %v982_v6  ;;  %v6104_v0 = vsub.f32 %v722_v23, %v6084_v41  ;;  %v978_v42 = vand.u32 4294901760, %v977_v1  ;;  %v659_v23 = vld [vmem:[%s7405_s3 + $0x38] sm:$0xff] }
  0xed   : > { %v989_v18 = vsub.f32 %v6071_v20, %v988_v57  ;;  %v6100_v58 = vpack.c.bf16 %v988_v57, %v976_v15  ;;  %v839_v62 = vsub.f32 %v6047_v43, %v838_v60  ;;  %v6109_v31 = vand.u32 4294901760, %v725_v28 }
  0xee   : > { %v996_v36 = vand.u32 4294901760, %v995_v4  ;;  %v728_v63 = vsel %vm708_vm0, %v658_v61, 0  ;;  %v860_v1 = vand.u32 4294901760, %v6104_v0  ;;  %v4714_v4 = vpack.c.bf16 %v5919_v17, %v5908_v56 }
  0xef   : > { %819 = vmatmul.mubr.f32.vlgmr.msra.gmra.mrb[0].mxu1 %v818_v51  ;;  %v990_v6 = vand.u32 4294901760, %v989_v18  ;;  %v850_v51 = vsub.f32 %v6082_v47, %v849_v35  ;;  %v840_v18 = vand.u32 4294901760, %v839_v62  ;;  %v6125_v61 = vand.u32 4294901760, %v728_v63 }
  0xf0   : > { %824 = vmatprep.mubr.f32.mxu1 %v7419_v37  ;;  %v4712_v15 = vpack.c.bf16 %v996_v36, %v984_v39  ;;  %v6123_v36 = vsub.f32 %v725_v28, %v6109_v31  ;;  %v731_v39 = vsel %vm708_vm0, %v659_v23, 0  ;;  %v861_v56 = vsub.f32 %v6104_v0, %v860_v1 }
  0xf1   : > { %v4710_v57 = vpack.c.bf16 %v990_v6, %v978_v42  ;;  %v4716_v42 = vpack.c.bf16 %v5914_v10, %v5905_v54  ;;  %v4718_v17 = vpack.c.bf16 %v5945_v40, %v5976_v13  ;;  %v6139_v6 = vsub.f32 %v728_v63, %v6125_v61 }
  0xf2   : > { %v871_v28 = vand.u32 4294901760, %v6123_v36  ;;  %v6141_v62 = vand.u32 4294901760, %v731_v39  ;;  %v4720_v54 = vpack.c.bf16 %v5938_v34, %v5972_v8  ;;  %v862_v10 = vand.u32 4294901760, %v861_v56 }
  0xf3   : > { %830 = vmatmul.mubr.f32.gmra.mrb[2].mxu1 %v829_v11  ;;  %4711 = vmatprep.subr.bf16.mxu0 %v4710_v57  ;;  %v851_v11 = vand.u32 4294901760, %v850_v51  ;;  %v4722_v40 = vpack.c.bf16 %v6008_v3, %v6029_v27  ;;  %v4724_v34 = vpack.c.bf16 %v6003_v19, %v6025_v22  ;;  %v4726_v8 = vpack.c.bf16 %v6071_v20, %v6057_v48 }
  0xf4   : > { %4713 = vmatpush1.bf16.msra.mxu0 %v4712_v15  ;;  %835 = vmatprep.mubr.f32.mxu1 %v7419_v37  ;;  %v872_v13 = vsub.f32 %v6123_v36, %v871_v28  ;;  %v882_v15 = vand.u32 4294901760, %v6139_v6  ;;  %v6155_v63 = vsub.f32 %v731_v39, %v6141_v62  ;;  %v4728_v19 = vpack.c.bf16 %v6067_v30, %v6050_v44  ;;  %v1740_v30 = vld [vmem:[%s7407_s5 + $0x8] sm:$0xff] }
  0xf5   : > { %4715 = vmatprep.subr.bf16.mxu0 %v4714_v4  ;;  %v7430_v44 = vand.u32 4294901760, %v5998_v59  ;;  %v1799_v23 = vsel %vm708_vm0, %v1740_v30, 0 }
  0xf6   : > { %v873_v3 = vand.u32 4294901760, %v872_v13  ;;  %v883_v27 = vsub.f32 %v6139_v6, %v882_v15  ;;  %v893_v57 = vand.u32 4294901760, %v6155_v63 }
  0xf7   : > { %841 = vmatmul.mubr.f32.gmra.mrb[4].mxu1 %v840_v18  ;;  %1048 = vmatmul.mubr.f32.vlgmr.msra.gmra.mrb[0].mxu0 %v5960_v52 }
  0xf8   : > { %4717 = vmatpush1.bf16.msra.mxu0 %v4716_v42  ;;  %846 = vmatprep.mubr.f32.mxu1 %v7419_v37  ;;  %v884_v22 = vand.u32 4294901760, %v883_v27  ;;  %v894_v48 = vsub.f32 %v6155_v63, %v893_v57  ;;  %v6305_v42 = vand.u32 4294901760, %v1799_v23 }
  0xf9   : > { %4719 = vmatprep.subr.bf16.mxu0 %v4718_v17  ;;  %1053 = vmatprep.mubr.f32.mxu0 %v7419_v37 }
  0xfa   : > { %v895_v20 = vand.u32 4294901760, %v894_v48 }
  0xfb   : > { %852 = vmatmul.mubr.f32.gmra.mrb[6].mxu1 %v851_v11  ;;  %1055 = vmatmul.mubr.f32.gmra.mrb[2].mxu0 %v6006_v2 }
  0xfc   : > { %4721 = vmatpush1.bf16.msra.mxu0 %v4720_v54  ;;  %857 = vmatprep.mubr.f32.mxu1 %v7419_v37 }
  0xfd   : > { %4723 = vmatprep.subr.bf16.mxu0 %v4722_v40  ;;  %1060 = vmatprep.mubr.f32.mxu0 %v7419_v37 }
  0xff   : > { %863 = vmatmul.mubr.f32.gmra.mrb[8].mxu1 %v862_v10  ;;  %1062 = vmatmul.mubr.f32.gmra.mrb[4].mxu0 %v6021_v21 }
 0x100   : > { %4725 = vmatpush1.bf16.msra.mxu0 %v4724_v34  ;;  %868 = vmatprep.mubr.f32.mxu1 %v7419_v37 }
 0x101   : > { %4727 = vmatprep.subr.bf16.mxu0 %v4726_v8  ;;  %1067 = vmatprep.mubr.f32.mxu0 %v7419_v37 }
 0x103   : > { %874 = vmatmul.mubr.f32.gmra.mrb[10].mxu1 %v873_v3  ;;  %1069 = vmatmul.mubr.f32.gmra.mrb[6].mxu0 %v6053_v49 }
 0x104   : > { %4729 = vmatpush1.bf16.msra.mxu0 %v4728_v19  ;;  %879 = vmatprep.mubr.f32.mxu1 %v7419_v37 }
 0x105   : > { %4731 = vmatprep.subr.bf16.mxu0 %v5917_v14  ;;  %1074 = vmatprep.mubr.f32.mxu0 %v7419_v37 }
 0x107   : > { %885 = vmatmul.mubr.f32.gmra.mrb[12].mxu1 %v884_v22  ;;  %1076 = vmatmul.mubr.f32.gmra.mrb[8].mxu0 %v6084_v41 }
 0x108   : > { %890 = vmatprep.mubr.f32.mxu1 %v7419_v37  ;;  %1081 = vmatprep.mubr.f32.mxu0 %v7419_v37 }
 0x10b   : > { %896 = vmatmul.mubr.f32.gmra.mrb[14].mxu1 %v895_v20  ;;  %1083 = vmatmul.mubr.f32.gmra.mrb[10].mxu0 %v6109_v31 }
 0x10c   : > { %1088 = vmatprep.mubr.f32.mxu0 %v7419_v37  ;;  %1899 = vmatprep.mubr.f32.mxu1 %v7419_v37 }
 0x10f   : > { %1090 = vmatmul.mubr.f32.gmra.mrb[12].mxu0 %v6125_v61 }
 0x110   : > { %1095 = vmatprep.mubr.f32.mxu0 %v7419_v37 }
 0x113   : > { %1097 = vmatmul.mubr.f32.gmra.mrb[14].mxu0 %v6141_v62 }
 0x114   : > { %1199 = vmatprep.mubr.f32.mxu0 %v7419_v37 }
 0x117   : > { %1202 = vmatmul.mubr.f32.vlgmr.msra.gmra.mrb[0].mxu0 %v5998_v59 }
 0x118   : > { %4733 = vmatpush1.bf16.msra.mxu0 %v5912_v9  ;;  %1207 = vmatprep.mubr.f32.mxu0 %v7419_v37 }
 0x119   : > { %4735 = vmatprep.subr.bf16.mxu0 %v5974_v12 }
 0x11b   : > { %1210 = vmatmul.mubr.f32.gmra.mrb[2].mxu0 %v6015_v16 }
 0x11c   : > { %4737 = vmatpush1.bf16.msra.mxu0 %v5970_v7  ;;  %1215 = vmatprep.mubr.f32.mxu0 %v7419_v37 }
 0x11d   : > { %4739 = vmatprep.subr.bf16.mxu0 %v6027_v26 }
 0x11f   : > { %1218 = vmatmul.mubr.f32.gmra.mrb[4].mxu0 %v6047_v43  ;;  %v1739_v43 = vld [vmem:[%s7407_s5] sm:$0xff] }
 0x120   : > { %4741 = vmatpush1.bf16.msra.mxu0 %v6023_v24  ;;  %1223 = vmatprep.mubr.f32.mxu0 %v7419_v37 }
 0x121   : > { %4743 = vmatprep.subr.bf16.mxu0 %v6069_v45 }
 0x123   : > { %1226 = vmatmul.mubr.f32.gmra.mrb[6].mxu0 %v6082_v47 }
 0x124   : > { %4745 = vmatpush1.bf16.msra.mxu0 %v6065_v25  ;;  %1231 = vmatprep.mubr.f32.mxu0 %v7419_v37 }
 0x125   : > { %4747 = vmatprep.subr.bf16.mxu0 %v5936_v32  ;;  %v7431_v32 = vand.u32 4294901760, %v6015_v16 }
 0x127   : > { %1234 = vmatmul.mubr.f32.gmra.mrb[8].mxu0 %v6104_v0 }
 0x128   : > { %1239 = vmatprep.mubr.f32.mxu0 %v7419_v37 }
 0x12b   : > { %1242 = vmatmul.mubr.f32.gmra.mrb[10].mxu0 %v6123_v36 }
 0x12c   : > { %1247 = vmatprep.mubr.f32.mxu0 %v7419_v37 }
 0x12f   : > { %1250 = vmatmul.mubr.f32.gmra.mrb[12].mxu0 %v6139_v6 }
 0x130   : > { %1255 = vmatprep.mubr.f32.mxu0 %v7419_v37 }
 0x133   : > { %1258 = vmatmul.mubr.f32.gmra.mrb[14].mxu0 %v6155_v63 }
 0x134   : > { %1344 = vmatprep.mubr.f32.mxu0 %v7419_v37 }
 0x137   : > { %1348 = vmatmul.mubr.f32.vlgmr.msra.gmra.mrb[0].mxu0 %v7430_v44 }
 0x138   : > { %4749 = vmatpush1.bf16.msra.mxu0 %v5933_v29  ;;  %1353 = vmatprep.mubr.f32.mxu0 %v7419_v37 }
 0x139   : > { %4751 = vmatprep.subr.bf16.mxu0 %v5994_v38 }
 0x13b   : > { %1357 = vmatmul.mubr.f32.gmra.mrb[2].mxu0 %v7431_v32 }
 0x13c   : > { %4753 = vmatpush1.bf16.msra.mxu0 %v5989_v33  ;;  %1362 = vmatprep.mubr.f32.mxu0 %v7419_v37 }
 0x13d   : > { %4755 = vmatprep.subr.bf16.mxu0 %v6061_v55  ;;  %v1796_v55 = vsel %vm708_vm0, %v1739_v43, 0 }
 0x13f   : > { %1366 = vmatmul.mubr.f32.gmra.mrb[4].mxu0 %v838_v60 }
 0x140   : > { %4757 = vmatpush1.bf16.msra.mxu0 %v6055_v50  ;;  %1371 = vmatprep.mubr.f32.mxu0 %v7419_v37  ;;  %v676_v50 = vpop.permute.xlu1 %675 }
 0x141   : > { %4759 = vmatprep.subr.bf16.mxu0 %v6100_v58  ;;  %v6299_v58 = vand.u32 4294901760, %v1796_v55 }
 0x143   : > { %1375 = vmatmul.mubr.f32.gmra.mrb[6].mxu0 %v849_v35  ;;  %v6303_v39 = vsub.f32 %v1796_v55, %v6299_v58  ;;  %v1742_v55 = vld [vmem:[%s7407_s5 + $0x18] sm:$0xff] }
 0x144   : > { %4761 = vmatpush1.bf16.msra.mxu0 %v6094_v5  ;;  %1380 = vmatprep.mubr.f32.mxu0 %v7419_v37  ;;  %v686_v51 = vpop.permute.xlu1 %685 }
 0x145   : > { %4763 = vmatprep.subr.bf16.mxu0 %v5917_v14  ;;  %v7418_v13 = vand.u32 4294901760, %v6303_v39 }
 0x147   : > { %1384 = vmatmul.mubr.f32.gmra.mrb[8].mxu0 %v860_v1  ;;  %v6318_v32 = vsub.f32 %v6303_v39, %v7418_v13 }
 0x148   : > { %1389 = vmatprep.mubr.f32.mxu0 %v7419_v37  ;;  %v696_v54 = vpop.permute.xlu1 %695 }
 0x14b   : > { %1393 = vmatmul.mubr.f32.gmra.mrb[10].mxu0 %v871_v28 }
 0x14c   : > { %1398 = vmatprep.mubr.f32.mxu0 %v7419_v37 }
 0x14f   : > { %1402 = vmatmul.mubr.f32.gmra.mrb[12].mxu0 %v882_v15  ;;  %v6312_v15 = vsub.f32 %v1799_v23, %v6305_v42 }
 0x150   : > { %1407 = vmatprep.mubr.f32.mxu0 %v7419_v37 }
 0x153   : > { %1411 = vmatmul.mubr.f32.gmra.mrb[14].mxu0 %v893_v57 }
 0x154   : > { %1529 = vmatprep.mubr.f32.mxu0 %v7419_v37 }
 0x157   : > { %1531 = vmatmul.mubr.f32.vlgmr.msra.gmra.mrb[0].mxu0 %v5960_v52 }
 0x158   : > { %4765 = vmatpush1.bf16.msra.mxu0 %v5912_v9  ;;  %1536 = vmatprep.mubr.f32.mxu0 %v7419_v37 }
 0x159   : > { %4767 = vmatprep.subr.bf16.mxu0 %v5974_v12 }
 0x15b   : > { %1538 = vmatmul.mubr.f32.gmra.mrb[2].mxu0 %v6006_v2 }
 0x15c   : > { %4769 = vmatpush1.bf16.msra.mxu0 %v5970_v7  ;;  %1543 = vmatprep.mubr.f32.mxu0 %v7419_v37 }
 0x15d   : > { %4771 = vmatprep.subr.bf16.mxu0 %v6027_v26 }
 0x15f   : > { %1545 = vmatmul.mubr.f32.gmra.mrb[4].mxu0 %v6021_v21 }
 0x160   : > { %4773 = vmatpush1.bf16.msra.mxu0 %v6023_v24  ;;  %1550 = vmatprep.mubr.f32.mxu0 %v7419_v37 }
 0x161   : > { %4775 = vmatprep.subr.bf16.mxu0 %v6069_v45 }
 0x163   : > { %1552 = vmatmul.mubr.f32.gmra.mrb[6].mxu0 %v6053_v49 }
 0x164   : > { %4777 = vmatpush1.bf16.msra.mxu0 %v6065_v25  ;;  %1557 = vmatprep.mubr.f32.mxu0 %v7419_v37 }
 0x167   : > { %1559 = vmatmul.mubr.f32.gmra.mrb[8].mxu0 %v6084_v41 }
 0x168   : > { %1564 = vmatprep.mubr.f32.mxu0 %v7419_v37 }
 0x16b   : > { %1566 = vmatmul.mubr.f32.gmra.mrb[10].mxu0 %v6109_v31 }
 0x16c   : > { %1571 = vmatprep.mubr.f32.mxu0 %v7419_v37 }
 0x16f   : > { %1573 = vmatmul.mubr.f32.gmra.mrb[12].mxu0 %v6125_v61 }
 0x170   : > { %1578 = vmatprep.mubr.f32.mxu0 %v7419_v37 }
 0x173   : > { %1580 = vmatmul.mubr.f32.gmra.mrb[14].mxu0 %v6141_v62 }
 0x174   : > { %1666 = vmatprep.mubr.f32.mxu0 %v7419_v37 }
 0x177   : > { %1668 = vmatmul.mubr.f32.vlgmr.msra.gmra.mrb[0].mxu0 %v5960_v52 }
 0x178   : > { %1673 = vmatprep.mubr.f32.mxu0 %v7419_v37 }
 0x17b   : > { %1675 = vmatmul.mubr.f32.gmra.mrb[2].mxu0 %v6006_v2 }
 0x17c   : > { %1680 = vmatprep.mubr.f32.mxu0 %v7419_v37 }
 0x17f   : > { %1682 = vmatmul.mubr.f32.gmra.mrb[4].mxu0 %v6021_v21 }
 0x180   : > { %1687 = vmatprep.mubr.f32.mxu0 %v7419_v37 }
 0x183   : > { %1689 = vmatmul.mubr.f32.gmra.mrb[6].mxu0 %v6053_v49  ;;  %v671_v49 = vpop.permute.xlu0 %670 }
 0x184   : > { %1694 = vmatprep.mubr.f32.mxu0 %v7419_v37 }
 0x187   : > { %1696 = vmatmul.mubr.f32.gmra.mrb[8].mxu0 %v6084_v41  ;;  %v681_v0 = vpop.permute.xlu0 %680 }
 0x188   : > { %1701 = vmatprep.mubr.f32.mxu0 %v7419_v37 }
 0x18b   : > { %1703 = vmatmul.mubr.f32.gmra.mrb[10].mxu0 %v6109_v31  ;;  %v691_v17 = vpop.permute.xlu0 %690 }
 0x18c   : > { %1708 = vmatprep.mubr.f32.mxu0 %v7419_v37 }
 0x18f   : > { %1710 = vmatmul.mubr.f32.gmra.mrb[12].mxu0 %v6125_v61 }
 0x190   : > { %1715 = vmatprep.mubr.f32.mxu0 %v7419_v37 }
 0x193   : > { %1717 = vmatmul.mubr.f32.gmra.mrb[14].mxu0 %v6141_v62  ;;  %v1741_v62 = vld [vmem:[%s7407_s5 + $0x10] sm:$0xff] }
 0x194   : > { %2985 = vmatprep.mubr.f32.mxu0 %v7419_v37  ;;  %v1802_v8 = vsel %vm708_vm0, %v1741_v62, 0 }
 0x1c2   : > { %v820_v45 = vpop.f32.mrb[0].mxu1 }
 0x1c3   : > { %v822_v9 = vpop.f32.mrb[1].mxu1  ;;  %v821_v25 = vadd.f32 %v820_v45, %v671_v49  ;;  %v7417_v45 = vand.u32 4294901760, %v6312_v15 }
 0x1c4   : > { %v823_v47 = vadd.f32 %v822_v9, %v671_v49 }
 0x1c6   : > { %v831_v14 = vpop.f32.mrb[2].mxu1 }
 0x1c7   : > { %v833_v29 = vpop.f32.mrb[3].mxu1  ;;  %v832_v1 = vadd.f32 %v831_v14, %v676_v50  ;;  %v701_v14 = vpop.permute.xlu0 %700 }
 0x1c8   : > { %v834_v4 = vadd.f32 %v833_v29, %v676_v50 }
 0x1ca   : > { %v842_v52 = vpop.f32.mrb[4].mxu1 }
 0x1cb   : > { %v844_v7 = vpop.f32.mrb[5].mxu1  ;;  %v843_v56 = vadd.f32 %v842_v52, %v681_v0 }
 0x1cc   : > { %v845_v28 = vadd.f32 %v844_v7, %v681_v0 }
 0x1ce   : > { %v853_v12 = vpop.f32.mrb[6].mxu1 }
 0x1cf   : > { %v855_v33 = vpop.f32.mrb[7].mxu1  ;;  %v854_v34 = vadd.f32 %v853_v12, %v686_v51  ;;  %v6321_v12 = vand.u32 4294901760, %v1802_v8 }
 0x1d0   : > { %v856_v3 = vadd.f32 %v855_v33, %v686_v51  ;;  %v706_v33 = vpop.permute.xlu1 %705  ;;  %v6350_v51 = vsel %vm708_vm0, %v1742_v55, 0 }
 0x1d1   : > { %v6346_v0 = vsub.f32 %v1802_v8, %v6321_v12 }
 0x1d2   : > { %v864_v38 = vpop.f32.mrb[8].mxu1 }
 0x1d3   : > { %v866_v59 = vpop.f32.mrb[9].mxu1  ;;  %v865_v27 = vadd.f32 %v864_v38, %v691_v17 }
 0x1d4   : > { %v867_v57 = vadd.f32 %v866_v59, %v691_v17 }
 0x1d6   : > { %v875_v2 = vpop.f32.mrb[10].mxu1 }
 0x1d7   : > { %v877_v35 = vpop.f32.mrb[11].mxu1  ;;  %v876_v48 = vadd.f32 %v875_v2, %v696_v54 }
 0x1d8   : > { %v878_v29 = vadd.f32 %v877_v35, %v696_v54 }
 0x1da   : > { %v6284_v16 = vpop.f32.mrb[12].mxu1 }
 0x1db   : > { %v6286_v21 = vpop.f32.mrb[13].mxu1  ;;  %v887_v38 = vadd.f32 %v6284_v16, %v701_v14 }
 0x1dc   : > { %v889_v59 = vadd.f32 %v6286_v21, %v701_v14 }
 0x1de   : > { %v6288_v24 = vpop.f32.mrb[14].mxu1 }
 0x1df   : > { %v6290_v26 = vpop.f32.mrb[15].mxu1  ;;  %v6326_v43 = vadd.f32 %v6288_v24, %v706_v33  ;;  %v6342_v24 = vsub.f32 %v6312_v15, %v7417_v45  ;;  %v6446_v45 = vand.u32 4294901760, %v6350_v51 }
 0x1e0   : > { %v6329_v49 = vadd.f32 %v6290_v26, %v706_v33 }
 0x24a   : > { %v1669_v41 = vpop.f32.mrb[0].mxu0 }
 0x24b   : > { %v5075_v60 = vadd.f32 %v1669_v41, %v821_v25  ;;  %v1671_v5 = vpop.f32.mrb[1].mxu0 }
 0x24c   : > { %v5077_v31 = vadd.f32 %v1671_v5, %v823_v47 }
 0x24d   : > { %5459 = vtanh.f32 %v5075_v60 }
 0x24e   : > { %5461 = vtanh.f32 %v5077_v31  ;;  %v1676_v18 = vpop.f32.mrb[2].mxu0 }
 0x24f   : > { %v5079_v36 = vadd.f32 %v1676_v18, %v832_v1  ;;  %v1678_v61 = vpop.f32.mrb[3].mxu0 }
 0x250   : > { %v5081_v11 = vadd.f32 %v1678_v61, %v834_v4 }
 0x251   : > { %5463 = vtanh.f32 %v5079_v36 }
 0x252   : > { %5465 = vtanh.f32 %v5081_v11  ;;  %v1683_v6 = vpop.f32.mrb[4].mxu0 }
 0x253   : > { %v5083_v10 = vadd.f32 %v1683_v6, %v843_v56  ;;  %v1685_v40 = vpop.f32.mrb[5].mxu0 }
 0x254   : > { %v5085_v63 = vadd.f32 %v1685_v40, %v845_v28 }
 0x255   : > { %5467 = vtanh.f32 %v5083_v10 }
 0x256   : > { %5469 = vtanh.f32 %v5085_v63  ;;  %v1690_v19 = vpop.f32.mrb[6].mxu0 }
 0x257   : > { %v5460_v22 = vpop.eup %5459  ;;  %v5087_v20 = vadd.f32 %v1690_v19, %v854_v34  ;;  %v1692_v44 = vpop.f32.mrb[7].mxu0 }
 0x258   : > { %v5462_v9 = vpop.eup %5461  ;;  %v5089_v52 = vadd.f32 %v1692_v44, %v856_v3  ;;  %v1821_v7 = vand.u32 4294901760, %v5460_v22 }
 0x259   : > { %5471 = vtanh.f32 %v5087_v20  ;;  %v1819_v2 = vand.u32 4294901760, %v5462_v9 }
 0x25a   : > { %5473 = vtanh.f32 %v5089_v52  ;;  %v1697_v50 = vpop.f32.mrb[8].mxu0  ;;  %v6331_v35 = vsub.f32 %v5460_v22, %v1821_v7 }
 0x25b   : > { %v5464_v25 = vpop.eup %5463  ;;  %v5091_v16 = vadd.f32 %v1697_v50, %v865_v27  ;;  %v1699_v30 = vpop.f32.mrb[9].mxu0  ;;  %v6336_v21 = vsub.f32 %v5462_v9, %v1819_v2 }
 0x25c   : > { %v5466_v26 = vpop.eup %5465  ;;  %v5093_v41 = vadd.f32 %v1699_v30, %v867_v57  ;;  %v1825_v60 = vand.u32 4294901760, %v5464_v25  ;;  %v1996_v5 = vand.u32 4294901760, %v6331_v35 }
 0x25d   : > { %5475 = vtanh.f32 %v5091_v16  ;;  %v1823_v31 = vand.u32 4294901760, %v5466_v26  ;;  %v1990_v23 = vand.u32 4294901760, %v6336_v21 }
 0x25e   : > { %5477 = vtanh.f32 %v5093_v41  ;;  %v1704_v1 = vpop.f32.mrb[10].mxu0  ;;  %v6352_v4 = vpack.c.bf16 %v1825_v60, %v1821_v7  ;;  %v6354_v18 = vsub.f32 %v5464_v25, %v1825_v60  ;;  %v1997_v36 = vsub.f32 %v6331_v35, %v1996_v5 }
 0x25f   : > { %v5468_v61 = vpop.eup %5467  ;;  %v5095_v11 = vadd.f32 %v1704_v1, %v876_v48  ;;  %v1706_v56 = vpop.f32.mrb[11].mxu0  ;;  %v6359_v17 = vpack.c.bf16 %v1823_v31, %v1819_v2  ;;  %v6361_v28 = vsub.f32 %v5466_v26, %v1823_v31  ;;  %v1991_v6 = vsub.f32 %v6336_v21, %v1990_v23 }
 0x260   : > { %v5470_v62 = vpop.eup %5469  ;;  %v5097_v54 = vadd.f32 %v1706_v56, %v878_v29  ;;  %v1829_v10 = vand.u32 4294901760, %v5468_v61  ;;  %v1998_v40 = vand.u32 4294901760, %v1997_v36  ;;  %v2008_v63 = vand.u32 4294901760, %v6354_v18 }
 0x261   : > { %5479 = vtanh.f32 %v5095_v11  ;;  %4779 = vmatprep.subr.bf16.mxu1 %v6359_v17  ;;  %v1827_v34 = vand.u32 4294901760, %v5470_v62  ;;  %v1992_v8 = vand.u32 4294901760, %v1991_v6  ;;  %v2002_v3 = vand.u32 4294901760, %v6361_v28 }
 0x262   : > { %5481 = vtanh.f32 %v5097_v54  ;;  %v1711_v27 = vpop.f32.mrb[12].mxu0  ;;  %4781 = vmatpush1.bf16.msra.mxu1 %v6352_v4  ;;  %v6370_v57 = vsub.f32 %v5468_v61, %v1829_v10  ;;  %v2009_v19 = vsub.f32 %v6354_v18, %v2008_v63 }
 0x263   : > { %v5472_v48 = vpop.eup %5471  ;;  %v5099_v20 = vadd.f32 %v1711_v27, %v887_v38  ;;  %v1713_v44 = vpop.f32.mrb[13].mxu0  ;;  %v6377_v9 = vsub.f32 %v5470_v62, %v1827_v34  ;;  %v2003_v14 = vsub.f32 %v6361_v28, %v2002_v3 }
 0x264   : > { %v5474_v52 = vpop.eup %5473  ;;  %v5101_v7 = vadd.f32 %v1713_v44, %v889_v59  ;;  %v1833_v33 = vand.u32 4294901760, %v5472_v48  ;;  %v2010_v2 = vand.u32 4294901760, %v2009_v19  ;;  %v2020_v50 = vand.u32 4294901760, %v6370_v57 }
 0x265   : > { %5483 = vtanh.f32 %v5099_v20  ;;  %v1831_v55 = vand.u32 4294901760, %v5474_v52  ;;  %v2004_v25 = vand.u32 4294901760, %v2003_v14  ;;  %v2014_v16 = vand.u32 4294901760, %v6377_v9 }
 0x266   : > { %5485 = vtanh.f32 %v5101_v7  ;;  %v1718_v38 = vpop.f32.mrb[14].mxu0  ;;  %v6384_v30 = vpack.c.bf16 %v1833_v33, %v1829_v10  ;;  %v6386_v26 = vsub.f32 %v5472_v48, %v1833_v33  ;;  %v6388_v41 = vpack.c.bf16 %v2010_v2, %v1998_v40 }
 0x267   : > { %v5476_v60 = vpop.eup %5475  ;;  %v5103_v59 = vadd.f32 %v1718_v38, %v6326_v43  ;;  %v1720_v31 = vpop.f32.mrb[15].mxu0  ;;  %v6391_v1 = vpack.c.bf16 %v1831_v55, %v1827_v34  ;;  %v6393_v36 = vsub.f32 %v5474_v52, %v1831_v55  ;;  %v6395_v61 = vpack.c.bf16 %v2004_v25, %v1992_v8 }
 0x268   : > { %v5478_v11 = vpop.eup %5477  ;;  %v5105_v56 = vadd.f32 %v1720_v31, %v6329_v49  ;;  %v1837_v6 = vand.u32 4294901760, %v5476_v60  ;;  %v2015_v62 = vsub.f32 %v6377_v9, %v2014_v16  ;;  %v2021_v54 = vsub.f32 %v6370_v57, %v2020_v50 }
 0x269   : > { %5487 = vtanh.f32 %v5103_v59  ;;  %4783 = vmatprep.subr.bf16.mxu1 %v6391_v1  ;;  %v1835_v43 = vand.u32 4294901760, %v5478_v11  ;;  %v2026_v10 = vand.u32 4294901760, %v6393_v36  ;;  %v2032_v40 = vand.u32 4294901760, %v6386_v26 }
 0x26a   : > { %5489 = vtanh.f32 %v5105_v56  ;;  %4785 = vmatpush1.bf16.msra.mxu1 %v6384_v30  ;;  %v6408_v49 = vsub.f32 %v5476_v60, %v1837_v6  ;;  %v2016_v34 = vand.u32 4294901760, %v2015_v62  ;;  %v2022_v8 = vand.u32 4294901760, %v2021_v54 }
 0x26b   : > { %v5480_v27 = vpop.eup %5479  ;;  %v6410_v19 = vsub.f32 %v5478_v11, %v1835_v43  ;;  %v2027_v48 = vsub.f32 %v6393_v36, %v2026_v10  ;;  %v2033_v20 = vsub.f32 %v6386_v26, %v2032_v40  ;;  %v6421_v2 = vpack.c.bf16 %v2002_v3, %v1990_v23 }
 0x26c   : > { %v5482_v14 = vpop.eup %5481  ;;  %v1841_v52 = vand.u32 4294901760, %v5480_v27  ;;  %v2044_v7 = vand.u32 4294901760, %v6408_v49  ;;  %v6433_v56 = vpack.c.bf16 %v2008_v63, %v1996_v5 }
 0x26d   : > { %v1839_v55 = vand.u32 4294901760, %v5482_v14  ;;  %v2028_v25 = vand.u32 4294901760, %v2027_v48  ;;  %v2034_v38 = vand.u32 4294901760, %v2033_v20  ;;  %v2038_v60 = vand.u32 4294901760, %v6410_v19 }
 0x26e   : > { %v6424_v59 = vpack.c.bf16 %v1841_v52, %v1837_v6  ;;  %v6426_v31 = vsub.f32 %v5480_v27, %v1841_v52  ;;  %v2045_v11 = vsub.f32 %v6408_v49, %v2044_v7 }
 0x26f   : > { %v5484_v62 = vpop.eup %5483  ;;  %v6435_v23 = vpack.c.bf16 %v1839_v55, %v1835_v43  ;;  %v6437_v3 = vsub.f32 %v5482_v14, %v1839_v55  ;;  %v6439_v54 = vpack.c.bf16 %v2028_v25, %v2016_v34  ;;  %v6441_v48 = vpack.c.bf16 %v2034_v38, %v2022_v8  ;;  %v1743_v34 = vld [vmem:[%s7407_s5 + $0x20] sm:$0xff] }
 0x270   : > { %v5486_v6 = vpop.eup %5485  ;;  %v1845_v27 = vand.u32 4294901760, %v5484_v62  ;;  %v2039_v20 = vsub.f32 %v6410_v19, %v2038_v60  ;;  %v2056_v52 = vand.u32 4294901760, %v6426_v31  ;;  %v2046_v14 = vand.u32 4294901760, %v2045_v11 }
 0x271   : > { %4787 = vmatprep.subr.bf16.mxu1 %v6435_v23  ;;  %v1843_v5 = vand.u32 4294901760, %v5486_v6  ;;  %v2050_v63 = vand.u32 4294901760, %v6437_v3  ;;  %v6460_v25 = vpack.c.bf16 %v2026_v10, %v2014_v16 }
 0x272   : > { %4789 = vmatpush1.bf16.msra.mxu1 %v6424_v59  ;;  %v6455_v8 = vsub.f32 %v5484_v62, %v1845_v27  ;;  %v2057_v55 = vsub.f32 %v6426_v31, %v2056_v52  ;;  %v6470_v62 = vpack.c.bf16 %v2032_v40, %v2020_v50  ;;  %v6475_v10 = vpack.c.bf16 %v2056_v52, %v2044_v7 }
 0x273   : > { %v5488_v38 = vpop.eup %5487  ;;  %v6462_v13 = vsub.f32 %v5486_v6, %v1843_v5  ;;  %v2051_v33 = vsub.f32 %v6437_v3, %v2050_v63  ;;  %v6472_v11 = vpack.c.bf16 %v2050_v63, %v2038_v60  ;;  %v2040_v22 = vand.u32 4294901760, %v2039_v20 }
 0x274   : > { %v5490_v43 = vpop.eup %5489  ;;  %v1849_v44 = vand.u32 4294901760, %v5488_v38  ;;  %v2058_v29 = vand.u32 4294901760, %v2057_v55  ;;  %v2068_v16 = vand.u32 4294901760, %v6455_v8  ;;  %7433 = vst [vmem:[#allocation9_spill] sm:$0xff] %v6475_v10  ;;  %v1808_v40 = vsel %vm708_vm0, %v1743_v34, 0 }
 0x275   : > { %7432 = vst [vmem:[#allocation8_spill] sm:$0xff] %v6472_v11  ;;  %v1847_v6 = vand.u32 4294901760, %v5490_v43  ;;  %v2052_v37 = vand.u32 4294901760, %v2051_v33  ;;  %v2062_v47 = vand.u32 4294901760, %v6462_v13  ;;  %v7423_v7 = vand.u32 4294901760, %v6346_v0  ;;  %v1744_v33 = vld [vmem:[%s7407_s5 + $0x28] sm:$0xff] }
 0x276   : > { %v6478_v46 = vpack.c.bf16 %v1849_v44, %v1845_v27  ;;  %v6480_v53 = vsub.f32 %v5488_v38, %v1849_v44  ;;  %v4804_v50 = vpack.c.bf16 %v2058_v29, %v2046_v14  ;;  %v6493_v27 = vsub.f32 %v6350_v51, %v6446_v45 }
 0x277   : > { %v6483_v60 = vpack.c.bf16 %v1847_v6, %v1843_v5  ;;  %v6485_v63 = vsub.f32 %v5490_v43, %v1847_v6  ;;  %v4802_v55 = vpack.c.bf16 %v2052_v37, %v2040_v22  ;;  %v2069_v44 = vsub.f32 %v6455_v8, %v2068_v16  ;;  %v1745_v6 = vld [vmem:[%s7407_s5 + $0x30] sm:$0xff] }
 0x278   : > { %v2080_v29 = vand.u32 4294901760, %v6480_v53  ;;  %v2063_v37 = vsub.f32 %v6462_v13, %v2062_v47  ;;  %v6502_v52 = vand.u32 4294901760, %v1808_v40  ;;  %v1811_v43 = vsel %vm708_vm0, %v1744_v33, 0 }
 0x279   : > { %4791 = vmatprep.subr.bf16.mxu1 %v6483_v60  ;;  %v2074_v22 = vand.u32 4294901760, %v6485_v63  ;;  %v1915_v14 = vand.u32 4294901760, %v6342_v24  ;;  %v1925_v5 = vsub.f32 %v6346_v0, %v7423_v7  ;;  %v1935_v33 = vand.u32 4294901760, %v6493_v27 }
 0x27a   : > { %4793 = vmatpush1.bf16.msra.mxu1 %v6478_v46  ;;  %v2081_v51 = vsub.f32 %v6480_v53, %v2080_v29  ;;  %v6509_v34 = vpack.c.bf16 %v2080_v29, %v2068_v16  ;;  %v2070_v16 = vand.u32 4294901760, %v2069_v44  ;;  %v2064_v24 = vand.u32 4294901760, %v2063_v37 }
 0x27b   : > { %4795 = vmatprep.subr.bf16.mxu1 %v6395_v61  ;;  %v2075_v38 = vsub.f32 %v6485_v63, %v2074_v22  ;;  %v6517_v20 = vpack.c.bf16 %v2074_v22, %v2062_v47  ;;  %v7435_v61 = vand.u32 4294901760, %v6318_v32  ;;  %v6526_v10 = vsub.f32 %v1808_v40, %v6502_v52  ;;  %v1746_v32 = vld [vmem:[%s7407_s5 + $0x38] sm:$0xff] }
 0x27c   : > { %7434 = vst [vmem:[#allocation10_spill] sm:$0xff] %v6509_v34  ;;  %v2082_v29 = vand.u32 4294901760, %v2081_v51  ;;  %v6528_v11 = vand.u32 4294901760, %v1811_v43  ;;  %v7436_v47 = vmov 0.0   ;;  %v1814_v7 = vsel %vm708_vm0, %v1745_v6, 0 }
 0x27d   : > { %1905 = vmatmul.mubr.f32.vlgmr.msra.gmra.mrb[16].mxu1 %v7435_v61  ;;  %v2076_v34 = vand.u32 4294901760, %v2075_v38  ;;  %v1936_v40 = vsub.f32 %v6493_v27, %v1935_v33  ;;  %v1926_v37 = vand.u32 4294901760, %v1925_v5  ;;  %v6544_v38 = vand.u32 4294901760, %v1814_v7 }
 0x27e   : > { %4797 = vmatpush1.bf16.msra.mxu1 %v6388_v41  ;;  %1910 = vmatprep.mubr.f32.mxu1 %v7436_v47  ;;  %v4808_v22 = vpack.c.bf16 %v2082_v29, %v2070_v16  ;;  %v1946_v41 = vand.u32 4294901760, %v6526_v10  ;;  %v6542_v51 = vsub.f32 %v1811_v43, %v6528_v11 }
 0x27f   : > { %4799 = vmatprep.subr.bf16.mxu1 %v6439_v54  ;;  %v4806_v44 = vpack.c.bf16 %v2076_v34, %v2064_v24  ;;  %v1817_v54 = vsel %vm708_vm0, %v1746_v32, 0  ;;  %v1937_v34 = vand.u32 4294901760, %v1936_v40  ;;  %v6554_v43 = vsub.f32 %v1814_v7, %v6544_v38 }
 0x280   : > { %v1947_v5 = vsub.f32 %v6526_v10, %v1946_v41  ;;  %v6556_v6 = vand.u32 4294901760, %v1817_v54  ;;  %v7439_v32 = vpack.c.bf16 %v6393_v36, %v6377_v9  ;;  %v7440_v40 = vpack.c.bf16 %v6386_v26, %v6370_v57  ;;  %v7447_v9 = vld [vmem:[#allocation8_spill] sm:$0xff]  ;;  %v1763_v36 = vpop.permute.xlu1 %1762 }
 0x281   : > { %1916 = vmatmul.mubr.f32.gmra.mrb[18].mxu1 %v1915_v14  ;;  %v1957_v14 = vand.u32 4294901760, %v6542_v51  ;;  %v1968_v16 = vand.u32 4294901760, %v6554_v43  ;;  %v7444_v57 = vpack.c.bf16 %v6480_v53, %v6455_v8  ;;  %v7445_v53 = vand.u32 4294901760, %v6303_v39  ;;  %v2827_v8 = vld [vmem:[%s7409_s7 + $0x10] sm:$0xff] }
 0x282   : > { %4801 = vmatpush1.bf16.msra.mxu1 %v6441_v48  ;;  %1921 = vmatprep.mubr.f32.mxu1 %v7436_v47  ;;  %v1948_v48 = vand.u32 4294901760, %v1947_v5  ;;  %v6564_v29 = vsub.f32 %v1817_v54, %v6556_v6  ;;  %v7448_v26 = vand.u32 4294901760, %v6346_v0 }
 0x283   : > { %4803 = vmatprep.subr.bf16.mxu1 %v4802_v55  ;;  %v1958_v55 = vsub.f32 %v6542_v51, %v1957_v14  ;;  %v1969_v61 = vsub.f32 %v6554_v43, %v1968_v16 }
 0x284   : > { %v1979_v24 = vand.u32 4294901760, %v6564_v29 }
 0x285   : > { %1927 = vmatmul.mubr.f32.gmra.mrb[20].mxu1 %v1926_v37  ;;  %v1959_v7 = vand.u32 4294901760, %v1958_v55  ;;  %v7441_v37 = vpack.c.bf16 %v6437_v3, %v6410_v19 }
 0x286   : > { %4805 = vmatpush1.bf16.msra.mxu1 %v4804_v50  ;;  %1932 = vmatprep.mubr.f32.mxu1 %v7436_v47  ;;  %v7437_v50 = vpack.c.bf16 %v6361_v28, %v6336_v21  ;;  %v7438_v28 = vpack.c.bf16 %v6354_v18, %v6331_v35  ;;  %v7442_v35 = vpack.c.bf16 %v6426_v31, %v6408_v49 }
 0x287   : > { %4807 = vmatprep.subr.bf16.mxu1 %v4806_v44  ;;  %v1970_v44 = vand.u32 4294901760, %v1969_v61  ;;  %v7443_v18 = vpack.c.bf16 %v6485_v63, %v6462_v13  ;;  %v7446_v13 = vand.u32 4294901760, %v6312_v15  ;;  %v2888_v63 = vsel %vm708_vm0, %v2827_v8, 0 }
 0x289   : > { %1938 = vmatmul.mubr.f32.gmra.mrb[22].mxu1 %v1937_v34 }
 0x28a   : > { %4809 = vmatpush1.bf16.msra.mxu1 %v4808_v22  ;;  %1943 = vmatprep.mubr.f32.mxu1 %v7436_v47  ;;  %v1980_v22 = vsub.f32 %v6564_v29, %v1979_v24 }
 0x28b   : > { %4811 = vmatprep.subr.bf16.mxu1 %v7437_v50 }
 0x28c   : > { %v1981_v21 = vand.u32 4294901760, %v1980_v22 }
 0x28d   : > { %1949 = vmatmul.mubr.f32.gmra.mrb[24].mxu1 %v1948_v48 }
 0x28e   : > { %1954 = vmatprep.mubr.f32.mxu1 %v7436_v47 }
 0x291   : > { %1960 = vmatmul.mubr.f32.gmra.mrb[26].mxu1 %v1959_v7 }
 0x292   : > { %1965 = vmatprep.mubr.f32.mxu1 %v7436_v47 }
 0x295   : > { %1971 = vmatmul.mubr.f32.gmra.mrb[28].mxu1 %v1970_v44 }
 0x296   : > { %1976 = vmatprep.mubr.f32.mxu1 %v7436_v47 }
 0x299   : > { %1982 = vmatmul.mubr.f32.gmra.mrb[30].mxu1 %v1981_v21 }
 0x29a   : > { %2132 = vmatprep.mubr.f32.mxu1 %v7436_v47 }
 0x29d   : > { %2134 = vmatmul.mubr.f32.vlgmr.msra.gmra.mrb[16].mxu1 %v6299_v58 }
 0x29e   : > { %4813 = vmatpush1.bf16.msra.mxu1 %v7438_v28  ;;  %2139 = vmatprep.mubr.f32.mxu1 %v7436_v47 }
 0x29f   : > { %4815 = vmatprep.subr.bf16.mxu1 %v7439_v32 }
 0x2a1   : > { %2141 = vmatmul.mubr.f32.gmra.mrb[18].mxu1 %v6305_v42 }
 0x2a2   : > { %4817 = vmatpush1.bf16.msra.mxu1 %v7440_v40  ;;  %2146 = vmatprep.mubr.f32.mxu1 %v7436_v47 }
 0x2a3   : > { %4819 = vmatprep.subr.bf16.mxu1 %v7441_v37 }
 0x2a5   : > { %2148 = vmatmul.mubr.f32.gmra.mrb[20].mxu1 %v6321_v12 }
 0x2a6   : > { %4821 = vmatpush1.bf16.msra.mxu1 %v7442_v35  ;;  %2153 = vmatprep.mubr.f32.mxu1 %v7436_v47 }
 0x2a7   : > { %4823 = vmatprep.subr.bf16.mxu1 %v7443_v18 }
 0x2a9   : > { %2155 = vmatmul.mubr.f32.gmra.mrb[22].mxu1 %v6446_v45 }
 0x2aa   : > { %4825 = vmatpush1.bf16.msra.mxu1 %v7444_v57  ;;  %2160 = vmatprep.mubr.f32.mxu1 %v7436_v47 }
 0x2ab   : > { %4827 = vmatprep.subr.bf16.mxu1 %v6359_v17 }
 0x2ad   : > { %2162 = vmatmul.mubr.f32.gmra.mrb[24].mxu1 %v6502_v52 }
 0x2ae   : > { %2167 = vmatprep.mubr.f32.mxu1 %v7436_v47 }
 0x2b1   : > { %2169 = vmatmul.mubr.f32.gmra.mrb[26].mxu1 %v6528_v11 }
 0x2b2   : > { %2174 = vmatprep.mubr.f32.mxu1 %v7436_v47 }
 0x2b5   : > { %2176 = vmatmul.mubr.f32.gmra.mrb[28].mxu1 %v6544_v38 }
 0x2b6   : > { %2181 = vmatprep.mubr.f32.mxu1 %v7436_v47 }
 0x2b9   : > { %2183 = vmatmul.mubr.f32.gmra.mrb[30].mxu1 %v6556_v6 }
 0x2ba   : > { %2285 = vmatprep.mubr.f32.mxu1 %v7436_v47 }
 0x2bd   : > { %2288 = vmatmul.mubr.f32.vlgmr.msra.gmra.mrb[16].mxu1 %v6303_v39  ;;  %v7449_v39 = vld [vmem:[#allocation9_spill] sm:$0xff] }
 0x2be   : > { %4829 = vmatpush1.bf16.msra.mxu1 %v6352_v4  ;;  %2293 = vmatprep.mubr.f32.mxu1 %v7436_v47 }
 0x2bf   : > { %4831 = vmatprep.subr.bf16.mxu1 %v6391_v1 }
 0x2c1   : > { %2296 = vmatmul.mubr.f32.gmra.mrb[18].mxu1 %v6312_v15  ;;  %v7450_v15 = vld [vmem:[#allocation10_spill] sm:$0xff] }
 0x2c2   : > { %4833 = vmatpush1.bf16.msra.mxu1 %v6384_v30  ;;  %2301 = vmatprep.mubr.f32.mxu1 %v7436_v47 }
 0x2c3   : > { %4835 = vmatprep.subr.bf16.mxu1 %v6435_v23 }
 0x2c5   : > { %2304 = vmatmul.mubr.f32.gmra.mrb[20].mxu1 %v6346_v0 }
 0x2c6   : > { %4837 = vmatpush1.bf16.msra.mxu1 %v6424_v59  ;;  %2309 = vmatprep.mubr.f32.mxu1 %v7436_v47 }
 0x2c7   : > { %4839 = vmatprep.subr.bf16.mxu1 %v6483_v60 }
 0x2c9   : > { %2312 = vmatmul.mubr.f32.gmra.mrb[22].mxu1 %v6493_v27  ;;  %v1773_v27 = vpop.permute.xlu1 %1772 }
 0x2ca   : > { %4841 = vmatpush1.bf16.msra.mxu1 %v6478_v46  ;;  %2317 = vmatprep.mubr.f32.mxu1 %v7436_v47 }
 0x2cb   : > { %4843 = vmatprep.subr.bf16.mxu1 %v6421_v2 }
 0x2cd   : > { %2320 = vmatmul.mubr.f32.gmra.mrb[24].mxu1 %v6526_v10  ;;  %v1783_v57 = vpop.permute.xlu1 %1782 }
 0x2ce   : > { %2325 = vmatprep.mubr.f32.mxu1 %v7436_v47 }
 0x2d1   : > { %2328 = vmatmul.mubr.f32.gmra.mrb[26].mxu1 %v6542_v51 }
 0x2d2   : > { %2333 = vmatprep.mubr.f32.mxu1 %v7436_v47 }
 0x2d5   : > { %2336 = vmatmul.mubr.f32.gmra.mrb[28].mxu1 %v6554_v43 }
 0x2d6   : > { %2341 = vmatprep.mubr.f32.mxu1 %v7436_v47 }
 0x2d9   : > { %2344 = vmatmul.mubr.f32.gmra.mrb[30].mxu1 %v6564_v29 }
 0x2da   : > { %2430 = vmatprep.mubr.f32.mxu1 %v7436_v47 }
 0x2dd   : > { %2434 = vmatmul.mubr.f32.vlgmr.msra.gmra.mrb[16].mxu1 %v7445_v53 }
 0x2de   : > { %4845 = vmatpush1.bf16.msra.mxu1 %v6433_v56  ;;  %2439 = vmatprep.mubr.f32.mxu1 %v7436_v47 }
 0x2df   : > { %4847 = vmatprep.subr.bf16.mxu1 %v6460_v25 }
 0x2e1   : > { %2443 = vmatmul.mubr.f32.gmra.mrb[18].mxu1 %v7446_v13 }
 0x2e2   : > { %4849 = vmatpush1.bf16.msra.mxu1 %v6470_v62  ;;  %2448 = vmatprep.mubr.f32.mxu1 %v7436_v47 }
 0x2e3   : > { %4851 = vmatprep.subr.bf16.mxu1 %v7447_v9 }
 0x2e5   : > { %2452 = vmatmul.mubr.f32.gmra.mrb[20].mxu1 %v7448_v26 }
 0x2e6   : > { %4853 = vmatpush1.bf16.msra.mxu1 %v7449_v39  ;;  %2457 = vmatprep.mubr.f32.mxu1 %v7436_v47 }
 0x2e7   : > { %4855 = vmatprep.subr.bf16.mxu1 %v6517_v20 }
 0x2e9   : > { %2461 = vmatmul.mubr.f32.gmra.mrb[22].mxu1 %v1935_v33 }
 0x2ea   : > { %4857 = vmatpush1.bf16.msra.mxu1 %v7450_v15  ;;  %2466 = vmatprep.mubr.f32.mxu1 %v7436_v47 }
 0x2eb   : > { %4859 = vmatprep.subr.bf16.mxu1 %v6359_v17 }
 0x2ed   : > { %2470 = vmatmul.mubr.f32.gmra.mrb[24].mxu1 %v1946_v41 }
 0x2ee   : > { %2475 = vmatprep.mubr.f32.mxu1 %v7436_v47 }
 0x2f1   : > { %2479 = vmatmul.mubr.f32.gmra.mrb[26].mxu1 %v1957_v14  ;;  %v6743_v14 = vand.u32 4294901760, %v2888_v63 }
 0x2f2   : > { %2484 = vmatprep.mubr.f32.mxu1 %v7436_v47 }
 0x2f3   : > { %v6760_v40 = vsub.f32 %v2888_v63, %v6743_v14 }
 0x2f5   : > { %2488 = vmatmul.mubr.f32.gmra.mrb[28].mxu1 %v1968_v16  ;;  %v2828_v16 = vld [vmem:[%s7409_s7 + $0x18] sm:$0xff] }
 0x2f6   : > { %2493 = vmatprep.mubr.f32.mxu1 %v7436_v47  ;;  %v6764_v18 = vsel %vm708_vm0, %v2828_v16, 0 }
 0x2f9   : > { %2497 = vmatmul.mubr.f32.gmra.mrb[30].mxu1 %v1979_v24 }
 0x2fa   : > { %2615 = vmatprep.mubr.f32.mxu1 %v7436_v47 }
 0x2fd   : > { %2617 = vmatmul.mubr.f32.vlgmr.msra.gmra.mrb[16].mxu1 %v6299_v58 }
 0x2fe   : > { %4861 = vmatpush1.bf16.msra.mxu1 %v6352_v4  ;;  %2622 = vmatprep.mubr.f32.mxu1 %v7436_v47 }
 0x2ff   : > { %4863 = vmatprep.subr.bf16.mxu1 %v6391_v1 }
 0x301   : > { %2624 = vmatmul.mubr.f32.gmra.mrb[18].mxu1 %v6305_v42 }
 0x302   : > { %4865 = vmatpush1.bf16.msra.mxu1 %v6384_v30  ;;  %2629 = vmatprep.mubr.f32.mxu1 %v7436_v47 }
 0x303   : > { %4867 = vmatprep.subr.bf16.mxu1 %v6435_v23 }
 0x305   : > { %2631 = vmatmul.mubr.f32.gmra.mrb[20].mxu1 %v6321_v12 }
 0x306   : > { %4869 = vmatpush1.bf16.msra.mxu1 %v6424_v59  ;;  %2636 = vmatprep.mubr.f32.mxu1 %v7436_v47 }
 0x307   : > { %4871 = vmatprep.subr.bf16.mxu1 %v6483_v60 }
 0x309   : > { %2638 = vmatmul.mubr.f32.gmra.mrb[22].mxu1 %v6446_v45 }
 0x30a   : > { %4873 = vmatpush1.bf16.msra.mxu1 %v6478_v46  ;;  %2643 = vmatprep.mubr.f32.mxu1 %v7436_v47  ;;  %v2825_v46 = vld [vmem:[%s7409_s7] sm:$0xff] }
 0x30d   : > { %2645 = vmatmul.mubr.f32.gmra.mrb[24].mxu1 %v6502_v52 }
 0x30e   : > { %2650 = vmatprep.mubr.f32.mxu1 %v7436_v47 }
 0x311   : > { %2652 = vmatmul.mubr.f32.gmra.mrb[26].mxu1 %v6528_v11 }
 0x312   : > { %2657 = vmatprep.mubr.f32.mxu1 %v7436_v47 }
 0x315   : > { %2659 = vmatmul.mubr.f32.gmra.mrb[28].mxu1 %v6544_v38 }
 0x316   : > { %2664 = vmatprep.mubr.f32.mxu1 %v7436_v47 }
 0x319   : > { %2666 = vmatmul.mubr.f32.gmra.mrb[30].mxu1 %v6556_v6 }
 0x31a   : > { %2752 = vmatprep.mubr.f32.mxu1 %v7436_v47 }
 0x31d   : > { %2754 = vmatmul.mubr.f32.vlgmr.msra.gmra.mrb[16].mxu1 %v6299_v58  ;;  %v2882_v58 = vsel %vm708_vm0, %v2825_v46, 0 }
 0x31e   : > { %2759 = vmatprep.mubr.f32.mxu1 %v7436_v47  ;;  %v6721_v17 = vand.u32 4294901760, %v2882_v58 }
 0x320   : > { %v6725_v59 = vsub.f32 %v2882_v58, %v6721_v17 }
 0x321   : > { %2761 = vmatmul.mubr.f32.gmra.mrb[18].mxu1 %v6305_v42  ;;  %v2826_v42 = vld [vmem:[%s7409_s7 + $0x8] sm:$0xff] }
 0x322   : > { %2766 = vmatprep.mubr.f32.mxu1 %v7436_v47  ;;  %v2885_v1 = vsel %vm708_vm0, %v2826_v42, 0 }
 0x323   : > { %v6727_v31 = vand.u32 4294901760, %v2885_v1 }
 0x325   : > { %2768 = vmatmul.mubr.f32.gmra.mrb[20].mxu1 %v6321_v12  ;;  %v6734_v10 = vsub.f32 %v2885_v1, %v6727_v31 }
 0x326   : > { %2773 = vmatprep.mubr.f32.mxu1 %v7436_v47 }
 0x329   : > { %2775 = vmatmul.mubr.f32.gmra.mrb[22].mxu1 %v6446_v45  ;;  %v1758_v45 = vpop.permute.xlu0 %1757 }
 0x32a   : > { %2780 = vmatprep.mubr.f32.mxu1 %v7436_v47 }
 0x32d   : > { %2782 = vmatmul.mubr.f32.gmra.mrb[24].mxu1 %v6502_v52  ;;  %v1768_v23 = vpop.permute.xlu0 %1767 }
 0x32e   : > { %2787 = vmatprep.mubr.f32.mxu1 %v7436_v47 }
 0x331   : > { %2789 = vmatmul.mubr.f32.gmra.mrb[26].mxu1 %v6528_v11  ;;  %v7425_v11 = vand.u32 4294901760, %v6725_v59 }
 0x332   : > { %2794 = vmatprep.mubr.f32.mxu1 %v7436_v47 }
 0x333   : > { %v6740_v51 = vsub.f32 %v6725_v59, %v7425_v11 }
 0x335   : > { %2796 = vmatmul.mubr.f32.gmra.mrb[28].mxu1 %v6544_v38  ;;  %v7424_v38 = vand.u32 4294901760, %v6734_v10 }
 0x336   : > { %2801 = vmatprep.mubr.f32.mxu1 %v7436_v47 }
 0x337   : > { %v6756_v44 = vsub.f32 %v6734_v10, %v7424_v38 }
 0x339   : > { %2803 = vmatmul.mubr.f32.gmra.mrb[30].mxu1 %v6556_v6  ;;  %v1778_v6 = vpop.permute.xlu0 %1777 }
 0x33a   : > { %3859 = vmatprep.mubr.f32.mxu1 %v7436_v47 }
 0x3f0   : > { %v2755_v12 = vpop.f32.mrb[16].mxu1 }
 0x3f1   : > { %v5106_v0 = vadd.f32 %v2755_v12, %v1758_v45  ;;  %v2757_v4 = vpop.f32.mrb[17].mxu1 }
 0x3f2   : > { %v5107_v30 = vadd.f32 %v2757_v4, %v1758_v45 }
 0x3f3   : > { %5491 = vtanh.f32 %v5106_v0 }
 0x3f4   : > { %5493 = vtanh.f32 %v5107_v30  ;;  %v2762_v49 = vpop.f32.mrb[18].mxu1 }
 0x3f5   : > { %v5108_v19 = vadd.f32 %v2762_v49, %v1763_v36  ;;  %v2764_v2 = vpop.f32.mrb[19].mxu1 }
 0x3f6   : > { %v5109_v56 = vadd.f32 %v2764_v2, %v1763_v36  ;;  %v1788_v2 = vpop.permute.xlu0 %1787 }
 0x3f7   : > { %5495 = vtanh.f32 %v5108_v19 }
 0x3f8   : > { %5497 = vtanh.f32 %v5109_v56  ;;  %v2769_v3 = vpop.f32.mrb[20].mxu1 }
 0x3f9   : > { %v5110_v25 = vadd.f32 %v2769_v3, %v1768_v23  ;;  %v2771_v62 = vpop.f32.mrb[21].mxu1 }
 0x3fa   : > { %v5111_v60 = vadd.f32 %v2771_v62, %v1768_v23 }
 0x3fb   : > { %5499 = vtanh.f32 %v5110_v25 }
 0x3fc   : > { %5501 = vtanh.f32 %v5111_v60  ;;  %v2776_v20 = vpop.f32.mrb[22].mxu1 }
 0x3fd   : > { %v5492_v52 = vpop.eup %5491  ;;  %v5112_v33 = vadd.f32 %v2776_v20, %v1773_v27  ;;  %v2778_v41 = vpop.f32.mrb[23].mxu1 }
 0x3fe   : > { %v5494_v54 = vpop.eup %5493  ;;  %v5113_v34 = vadd.f32 %v2778_v41, %v1773_v27  ;;  %v2907_v5 = vand.u32 4294901760, %v5492_v52 }
 0x3ff   : > { %5503 = vtanh.f32 %v5112_v33  ;;  %v2905_v43 = vand.u32 4294901760, %v5494_v54 }
 0x400   : > { %5505 = vtanh.f32 %v5113_v34  ;;  %v2783_v48 = vpop.f32.mrb[24].mxu1  ;;  %v6745_v55 = vsub.f32 %v5492_v52, %v2907_v5 }
 0x401   : > { %v5496_v29 = vpop.eup %5495  ;;  %v5114_v50 = vadd.f32 %v2783_v48, %v1778_v6  ;;  %v2785_v7 = vpop.f32.mrb[25].mxu1  ;;  %v6750_v61 = vsub.f32 %v5494_v54, %v2905_v43 }
 0x402   : > { %v5498_v22 = vpop.eup %5497  ;;  %v5115_v21 = vadd.f32 %v2785_v7, %v1778_v6  ;;  %v2911_v28 = vand.u32 4294901760, %v5496_v29  ;;  %v3082_v32 = vand.u32 4294901760, %v6745_v55  ;;  %v1793_v48 = vpop.permute.xlu1 %1792 }
 0x403   : > { %5507 = vtanh.f32 %v5114_v50  ;;  %v2909_v37 = vand.u32 4294901760, %v5498_v22  ;;  %v3076_v35 = vand.u32 4294901760, %v6750_v61 }
 0x404   : > { %5509 = vtanh.f32 %v5115_v21  ;;  %v2790_v53 = vpop.f32.mrb[26].mxu1  ;;  %v6766_v13 = vpack.c.bf16 %v2911_v28, %v2907_v5  ;;  %v6768_v9 = vsub.f32 %v5496_v29, %v2911_v28  ;;  %v3083_v26 = vsub.f32 %v6745_v55, %v3082_v32 }
 0x405   : > { %v5500_v39 = vpop.eup %5499  ;;  %v5116_v15 = vadd.f32 %v2790_v53, %v1783_v57  ;;  %v2792_v46 = vpop.f32.mrb[27].mxu1  ;;  %v6773_v58 = vpack.c.bf16 %v2909_v37, %v2905_v43  ;;  %v3077_v42 = vsub.f32 %v6750_v61, %v3076_v35  ;;  %v6778_v45 = vsub.f32 %v5498_v22, %v2909_v37 }
 0x406   : > { %v5502_v12 = vpop.eup %5501  ;;  %v5117_v0 = vadd.f32 %v2792_v46, %v1783_v57  ;;  %v2915_v4 = vand.u32 4294901760, %v5500_v39  ;;  %v3084_v30 = vand.u32 4294901760, %v3083_v26  ;;  %v3094_v1 = vand.u32 4294901760, %v6768_v9 }
 0x407   : > { %5511 = vtanh.f32 %v5116_v15  ;;  %4875 = vmatprep.subr.bf16.mxu0 %v6773_v58  ;;  %5066 = vmatprep.subr.bf16.mxu1 %v6773_v58  ;;  %v2913_v36 = vand.u32 4294901760, %v5502_v12  ;;  %v3078_v49 = vand.u32 4294901760, %v3077_v42  ;;  %v3088_v19 = vand.u32 4294901760, %v6778_v45 }
 0x408   : > { %5513 = vtanh.f32 %v5117_v0  ;;  %v2797_v56 = vpop.f32.mrb[28].mxu1  ;;  %4877 = vmatpush1.bf16.msra.mxu0 %v6766_v13  ;;  %5070 = vmatpush1.bf16.msra.mxu1 %v6766_v13  ;;  %v6786_v23 = vsub.f32 %v5500_v39, %v2915_v4  ;;  %v3095_v3 = vsub.f32 %v6768_v9, %v3094_v1 }
 0x409   : > { %v5504_v25 = vpop.eup %5503  ;;  %v5118_v62 = vadd.f32 %v2797_v56, %v1788_v2  ;;  %v2799_v60 = vpop.f32.mrb[29].mxu1  ;;  %v3089_v63 = vsub.f32 %v6778_v45, %v3088_v19  ;;  %v6794_v27 = vsub.f32 %v5502_v12, %v2913_v36 }
 0x40a   : > { %v5506_v52 = vpop.eup %5505  ;;  %v5119_v33 = vadd.f32 %v2799_v60, %v1788_v2  ;;  %v2919_v41 = vand.u32 4294901760, %v5504_v25  ;;  %v3096_v54 = vand.u32 4294901760, %v3095_v3  ;;  %v3106_v34 = vand.u32 4294901760, %v6786_v23 }
 0x40b   : > { %5515 = vtanh.f32 %v5118_v62  ;;  %v2917_v5 = vand.u32 4294901760, %v5506_v52  ;;  %v3090_v43 = vand.u32 4294901760, %v3089_v63  ;;  %v3100_v6 = vand.u32 4294901760, %v6794_v27 }
 0x40c   : > { %5517 = vtanh.f32 %v5119_v33  ;;  %v2804_v16 = vpop.f32.mrb[30].mxu1  ;;  %v6800_v29 = vpack.c.bf16 %v2919_v41, %v2915_v4  ;;  %v6802_v50 = vsub.f32 %v5504_v25, %v2919_v41  ;;  %v6804_v7 = vpack.c.bf16 %v3096_v54, %v3084_v30 }
 0x40d   : > { %v5508_v22 = vpop.eup %5507  ;;  %v5120_v21 = vadd.f32 %v2804_v16, %v1793_v48  ;;  %v2806_v28 = vpop.f32.mrb[31].mxu1  ;;  %v6806_v37 = vpack.c.bf16 %v2917_v5, %v2913_v36  ;;  %v6808_v57 = vpack.c.bf16 %v3090_v43, %v3078_v49  ;;  %v3101_v53 = vsub.f32 %v6794_v27, %v3100_v6 }
 0x40e   : > { %v5510_v26 = vpop.eup %5509  ;;  %v5121_v39 = vadd.f32 %v2806_v28, %v1793_v48  ;;  %v2923_v15 = vand.u32 4294901760, %v5508_v22  ;;  %v6813_v46 = vsub.f32 %v5506_v52, %v2917_v5  ;;  %v3107_v42 = vsub.f32 %v6786_v23, %v3106_v34 }
 0x40f   : > { %5519 = vtanh.f32 %v5120_v21  ;;  %4879 = vmatprep.subr.bf16.mxu0 %v6806_v37  ;;  %5067 = vmatprep.subr.bf16.mxu1 %v6806_v37  ;;  %v2921_v12 = vand.u32 4294901760, %v5510_v26  ;;  %v3102_v0 = vand.u32 4294901760, %v3101_v53  ;;  %v3118_v4 = vand.u32 4294901760, %v6802_v50 }
 0x410   : > { %5521 = vtanh.f32 %v5121_v39  ;;  %4881 = vmatpush1.bf16.msra.mxu0 %v6800_v29  ;;  %5071 = vmatpush1.bf16.msra.mxu1 %v6800_v29  ;;  %v6823_v30 = vsub.f32 %v5508_v22, %v2923_v15  ;;  %v3112_v36 = vand.u32 4294901760, %v6813_v46  ;;  %v3108_v49 = vand.u32 4294901760, %v3107_v42 }
 0x411   : > { %v5512_v2 = vpop.eup %5511  ;;  %v3119_v56 = vsub.f32 %v6802_v50, %v3118_v4  ;;  %v6827_v3 = vsub.f32 %v5510_v26, %v2921_v12  ;;  %v6837_v41 = vpack.c.bf16 %v3088_v19, %v3076_v35  ;;  %v6844_v48 = vpack.c.bf16 %v3094_v1, %v3082_v32 }
 0x412   : > { %v5514_v60 = vpop.eup %5513  ;;  %v2927_v63 = vand.u32 4294901760, %v5512_v2  ;;  %v3113_v52 = vsub.f32 %v6813_v46, %v3112_v36  ;;  %v3130_v33 = vand.u32 4294901760, %v6823_v30  ;;  %v6884_v11 = vpack.c.bf16 %v3112_v36, %v3100_v6 }
 0x413   : > { %v2925_v54 = vand.u32 4294901760, %v5514_v60  ;;  %v3120_v5 = vand.u32 4294901760, %v3119_v56  ;;  %v3124_v43 = vand.u32 4294901760, %v6827_v3  ;;  %7451 = vst [vmem:[#allocation8_spill] sm:$0xff] %v6844_v48 }
 0x414   : > { %v6846_v16 = vpack.c.bf16 %v2927_v63, %v2923_v15  ;;  %v6848_v22 = vsub.f32 %v5512_v2, %v2927_v63  ;;  %v3114_v21 = vand.u32 4294901760, %v3113_v52  ;;  %v3131_v28 = vsub.f32 %v6823_v30, %v3130_v33 }
 0x415   : > { %v5516_v53 = vpop.eup %5515  ;;  %v6851_v35 = vpack.c.bf16 %v2925_v54, %v2921_v12  ;;  %v6853_v19 = vpack.c.bf16 %v3120_v5, %v3108_v49  ;;  %v3125_v26 = vsub.f32 %v6827_v3, %v3124_v43  ;;  %v6856_v39 = vsub.f32 %v5514_v60, %v2925_v54 }
 0x416   : > { %v5518_v42 = vpop.eup %5517  ;;  %v2931_v56 = vand.u32 4294901760, %v5516_v53  ;;  %v6858_v32 = vpack.c.bf16 %v3114_v21, %v3102_v0  ;;  %v3142_v1 = vand.u32 4294901760, %v6848_v22  ;;  %v6862_v15 = vand.u32 4294901760, %v6764_v18 }
 0x417   : > { %4883 = vmatprep.subr.bf16.mxu0 %v6851_v35  ;;  %5068 = vmatprep.subr.bf16.mxu1 %v6851_v35  ;;  %v2929_v12 = vand.u32 4294901760, %v5518_v42  ;;  %v3136_v49 = vand.u32 4294901760, %v6856_v39  ;;  %v3132_v2 = vand.u32 4294901760, %v3131_v28  ;;  %v3126_v63 = vand.u32 4294901760, %v3125_v26  ;;  %v2829_v28 = vld [vmem:[%s7409_s7 + $0x20] sm:$0xff] }
 0x418   : > { %4885 = vmatpush1.bf16.msra.mxu0 %v6846_v16  ;;  %5072 = vmatpush1.bf16.msra.mxu1 %v6846_v16  ;;  %v6871_v0 = vsub.f32 %v5516_v53, %v2931_v56  ;;  %v3143_v52 = vsub.f32 %v6848_v22, %v3142_v1  ;;  %v6888_v53 = vpack.c.bf16 %v3118_v4, %v3106_v34  ;;  %v2894_v34 = vsel %vm708_vm0, %v2829_v28, 0 }
 0x419   : > { %v5520_v5 = vpop.eup %5519  ;;  %v3137_v21 = vsub.f32 %v6856_v39, %v3136_v49  ;;  %v6877_v38 = vsub.f32 %v5518_v42, %v2929_v12  ;;  %v6891_v25 = vpack.c.bf16 %v3136_v49, %v3124_v43  ;;  %v6894_v24 = vpack.c.bf16 %v3142_v1, %v3130_v33  ;;  %v2830_v33 = vld [vmem:[%s7409_s7 + $0x28] sm:$0xff] }
 0x41a   : > { %v5522_v26 = vpop.eup %5521  ;;  %v2935_v60 = vand.u32 4294901760, %v5520_v5  ;;  %v3144_v54 = vand.u32 4294901760, %v3143_v52  ;;  %v3154_v62 = vand.u32 4294901760, %v6871_v0  ;;  %v3010_v43 = vand.u32 4294901760, %v6760_v40 }
 0x41b   : > { %7452 = vst [vmem:[#allocation9_spill] sm:$0xff] %v6891_v25  ;;  %v2933_v42 = vand.u32 4294901760, %v5522_v26  ;;  %v3138_v20 = vand.u32 4294901760, %v3137_v21  ;;  %v3148_v8 = vand.u32 4294901760, %v6877_v38  ;;  %7453 = vst [vmem:[#allocation10_spill] sm:$0xff] %v6894_v24  ;;  %v3001_v28 = vand.u32 4294901760, %v6756_v44 }
 0x41c   : > { %v6896_v48 = vpack.c.bf16 %v2935_v60, %v2931_v56  ;;  %v6898_v6 = vsub.f32 %v5520_v5, %v2935_v60  ;;  %v6900_v36 = vpack.c.bf16 %v3144_v54, %v3132_v2  ;;  %v6913_v56 = vsub.f32 %v6764_v18, %v6862_v15 }
 0x41d   : > { %v6903_v4 = vpack.c.bf16 %v2933_v42, %v2929_v12  ;;  %v4898_v52 = vpack.c.bf16 %v3138_v20, %v3126_v63  ;;  %v6906_v49 = vsub.f32 %v5522_v26, %v2933_v42  ;;  %v3155_v1 = vsub.f32 %v6871_v0, %v3154_v62  ;;  %v2831_v42 = vld [vmem:[%s7409_s7 + $0x30] sm:$0xff] }
 0x41e   : > { %v3166_v2 = vand.u32 4294901760, %v6898_v6  ;;  %v3149_v20 = vsub.f32 %v6877_v38, %v3148_v8  ;;  %v6923_v63 = vand.u32 4294901760, %v2894_v34  ;;  %v2897_v5 = vsel %vm708_vm0, %v2830_v33, 0 }
 0x41f   : > { %4887 = vmatprep.subr.bf16.mxu0 %v6903_v4  ;;  %5069 = vmatprep.subr.bf16.mxu1 %v6903_v4  ;;  %v3160_v60 = vand.u32 4294901760, %v6906_v49  ;;  %v3011_v18 = vsub.f32 %v6760_v40, %v3010_v43  ;;  %v3021_v33 = vand.u32 4294901760, %v6913_v56  ;;  %v6950_v25 = vand.u32 4294901760, %v2897_v5 }
 0x420   : > { %4889 = vmatpush1.bf16.msra.mxu0 %v6896_v48  ;;  %5073 = vmatpush1.bf16.msra.mxu1 %v6896_v48  ;;  %v3167_v54 = vsub.f32 %v6898_v6, %v3166_v2  ;;  %v6931_v21 = vpack.c.bf16 %v3166_v2, %v3154_v62  ;;  %v3156_v62 = vand.u32 4294901760, %v3155_v1  ;;  %v3150_v44 = vand.u32 4294901760, %v3149_v20  ;;  %v2832_v20 = vld [vmem:[%s7409_s7 + $0x38] sm:$0xff] }
 0x421   : > { %4891 = vmatprep.subr.bf16.mxu0 %v6808_v57  ;;  %v3161_v26 = vsub.f32 %v6906_v49, %v3160_v60  ;;  %v6939_v12 = vpack.c.bf16 %v3160_v60, %v3148_v8  ;;  %v7455_v57 = vand.u32 4294901760, %v6740_v51  ;;  %v6948_v24 = vsub.f32 %v2894_v34, %v6923_v63 }
 0x422   : > { %7454 = vst [vmem:[#allocation11_spill] sm:$0xff] %v6931_v21  ;;  %v3168_v2 = vand.u32 4294901760, %v3167_v54  ;;  %v2900_v1 = vsel %vm708_vm0, %v2831_v42, 0  ;;  %v3022_v34 = vsub.f32 %v6913_v56, %v3021_v33  ;;  %v6966_v54 = vsub.f32 %v2897_v5, %v6950_v25 }
 0x423   : > { %2991 = vmatmul.mubr.f32.vlgmr.msra.gmra.mrb[16].mxu0 %v7455_v57  ;;  %v3162_v21 = vand.u32 4294901760, %v3161_v26  ;;  %3861 = vmatmul.mubr.f32.vlgmr.msra.gmra.mrb[32].mxu1 %v6862_v15  ;;  %v3032_v60 = vand.u32 4294901760, %v6948_v24  ;;  %v6968_v26 = vand.u32 4294901760, %v2900_v1 }
 0x424   : > { %4893 = vmatpush1.bf16.msra.mxu0 %v6804_v7  ;;  %2996 = vmatprep.mubr.f32.mxu0 %v7436_v47  ;;  %v4904_v8 = vpack.c.bf16 %v3168_v2, %v3156_v62  ;;  %v3012_v7 = vand.u32 4294901760, %v3011_v18  ;;  %v3043_v5 = vand.u32 4294901760, %v6966_v54 }
 0x425   : > { %4895 = vmatprep.subr.bf16.mxu0 %v6858_v32  ;;  %v4902_v51 = vpack.c.bf16 %v3162_v21, %v3150_v44  ;;  %3866 = vmatprep.mubr.f32.mxu1 %v7436_v47  ;;  %v2903_v32 = vsel %vm708_vm0, %v2832_v20, 0  ;;  %v3023_v21 = vand.u32 4294901760, %v3022_v34  ;;  %v3033_v18 = vsub.f32 %v6948_v24, %v3032_v60 }
 0x426   : > { %v6982_v42 = vand.u32 4294901760, %v2903_v32  ;;  %v7458_v20 = vpack.c.bf16 %v6813_v46, %v6794_v27  ;;  %v7459_v34 = vpack.c.bf16 %v6802_v50, %v6786_v23  ;;  %v7463_v23 = vpack.c.bf16 %v6898_v6, %v6871_v0  ;;  %v7465_v27 = vld [vmem:[#allocation8_spill] sm:$0xff]  ;;  %v7467_v46 = vld [vmem:[#allocation9_spill] sm:$0xff] }
 0x427   : > { %3002 = vmatmul.mubr.f32.gmra.mrb[18].mxu0 %v3001_v28  ;;  %3868 = vmatmul.mubr.f32.gmra.mrb[34].mxu1 %v6923_v63  ;;  %v6980_v28 = vsub.f32 %v2900_v1, %v6968_v26  ;;  %v7466_v50 = vand.u32 4294901760, %v6734_v10 }
 0x428   : > { %4897 = vmatpush1.bf16.msra.mxu0 %v6853_v19  ;;  %3007 = vmatprep.mubr.f32.mxu0 %v7436_v47  ;;  %v3034_v19 = vand.u32 4294901760, %v3033_v18  ;;  %v6993_v2 = vsub.f32 %v2903_v32, %v6982_v42 }
 0x429   : > { %4899 = vmatprep.subr.bf16.mxu0 %v4898_v52  ;;  %3873 = vmatprep.mubr.f32.mxu1 %v7436_v47  ;;  %v3044_v52 = vsub.f32 %v6966_v54, %v3043_v5  ;;  %v3054_v62 = vand.u32 4294901760, %v6980_v28 }
 0x42a   : > { %v3065_v1 = vand.u32 4294901760, %v6993_v2 }
 0x42b   : > { %3013 = vmatmul.mubr.f32.gmra.mrb[20].mxu0 %v3012_v7  ;;  %3875 = vmatmul.mubr.f32.gmra.mrb[36].mxu1 %v6950_v25  ;;  %v3045_v57 = vand.u32 4294901760, %v3044_v52  ;;  %v3055_v44 = vsub.f32 %v6980_v28, %v3054_v62  ;;  %v7460_v7 = vpack.c.bf16 %v6856_v39, %v6827_v3 }
 0x42c   : > { %4901 = vmatpush1.bf16.msra.mxu0 %v6900_v36  ;;  %3018 = vmatprep.mubr.f32.mxu0 %v7436_v47  ;;  %v7456_v36 = vpack.c.bf16 %v6778_v45, %v6750_v61  ;;  %v3066_v61 = vsub.f32 %v6993_v2, %v3065_v1 }
 0x42d   : > { %4903 = vmatprep.subr.bf16.mxu0 %v4902_v51  ;;  %3880 = vmatprep.mubr.f32.mxu1 %v7436_v47  ;;  %v7457_v51 = vpack.c.bf16 %v6768_v9, %v6745_v55  ;;  %v7461_v55 = vpack.c.bf16 %v6848_v22, %v6823_v30  ;;  %v7462_v9 = vpack.c.bf16 %v6906_v49, %v6877_v38  ;;  %v7464_v38 = vand.u32 4294901760, %v6725_v59 }
 0x42e   : > { %v3067_v45 = vand.u32 4294901760, %v3066_v61 }
 0x42f   : > { %3024 = vmatmul.mubr.f32.gmra.mrb[22].mxu0 %v3023_v21  ;;  %3882 = vmatmul.mubr.f32.gmra.mrb[38].mxu1 %v6968_v26 }
 0x430   : > { %4905 = vmatpush1.bf16.msra.mxu0 %v4904_v8  ;;  %3029 = vmatprep.mubr.f32.mxu0 %v7436_v47  ;;  %v3056_v8 = vand.u32 4294901760, %v3055_v44 }
 0x431   : > { %4907 = vmatprep.subr.bf16.mxu0 %v7456_v36  ;;  %3887 = vmatprep.mubr.f32.mxu1 %v7436_v47 }
 0x433   : > { %3035 = vmatmul.mubr.f32.gmra.mrb[24].mxu0 %v3034_v19  ;;  %3889 = vmatmul.mubr.f32.gmra.mrb[40].mxu1 %v6982_v42 }
 0x434   : > { %3040 = vmatprep.mubr.f32.mxu0 %v7436_v47  ;;  %4005 = vmatprep.mubr.f32.mxu1 %v7436_v47 }
 0x437   : > { %3046 = vmatmul.mubr.f32.gmra.mrb[26].mxu0 %v3045_v57 }
 0x438   : > { %3051 = vmatprep.mubr.f32.mxu0 %v7436_v47 }
 0x43b   : > { %3057 = vmatmul.mubr.f32.gmra.mrb[28].mxu0 %v3056_v8 }
 0x43c   : > { %3062 = vmatprep.mubr.f32.mxu0 %v7436_v47 }
 0x43f   : > { %3068 = vmatmul.mubr.f32.gmra.mrb[30].mxu0 %v3067_v45 }
 0x440   : > { %3218 = vmatprep.mubr.f32.mxu0 %v7436_v47 }
 0x443   : > { %3220 = vmatmul.mubr.f32.vlgmr.msra.gmra.mrb[16].mxu0 %v6721_v17 }
 0x444   : > { %4909 = vmatpush1.bf16.msra.mxu0 %v7457_v51  ;;  %3225 = vmatprep.mubr.f32.mxu0 %v7436_v47 }
 0x445   : > { %4911 = vmatprep.subr.bf16.mxu0 %v7458_v20 }
 0x447   : > { %3227 = vmatmul.mubr.f32.gmra.mrb[18].mxu0 %v6727_v31 }
 0x448   : > { %4913 = vmatpush1.bf16.msra.mxu0 %v7459_v34  ;;  %3232 = vmatprep.mubr.f32.mxu0 %v7436_v47 }
 0x449   : > { %4915 = vmatprep.subr.bf16.mxu0 %v7460_v7 }
 0x44b   : > { %3234 = vmatmul.mubr.f32.gmra.mrb[20].mxu0 %v6743_v14 }
 0x44c   : > { %4917 = vmatpush1.bf16.msra.mxu0 %v7461_v55  ;;  %3239 = vmatprep.mubr.f32.mxu0 %v7436_v47 }
 0x44d   : > { %4919 = vmatprep.subr.bf16.mxu0 %v7462_v9 }
 0x44f   : > { %3241 = vmatmul.mubr.f32.gmra.mrb[22].mxu0 %v6862_v15 }
 0x450   : > { %4921 = vmatpush1.bf16.msra.mxu0 %v7463_v23  ;;  %3246 = vmatprep.mubr.f32.mxu0 %v7436_v47 }
 0x451   : > { %4923 = vmatprep.subr.bf16.mxu0 %v6773_v58 }
 0x453   : > { %3248 = vmatmul.mubr.f32.gmra.mrb[24].mxu0 %v6923_v63 }
 0x454   : > { %3253 = vmatprep.mubr.f32.mxu0 %v7436_v47 }
 0x457   : > { %3255 = vmatmul.mubr.f32.gmra.mrb[26].mxu0 %v6950_v25 }
 0x458   : > { %3260 = vmatprep.mubr.f32.mxu0 %v7436_v47 }
 0x45b   : > { %3262 = vmatmul.mubr.f32.gmra.mrb[28].mxu0 %v6968_v26 }
 0x45c   : > { %3267 = vmatprep.mubr.f32.mxu0 %v7436_v47 }
 0x45f   : > { %3269 = vmatmul.mubr.f32.gmra.mrb[30].mxu0 %v6982_v42 }
 0x460   : > { %3371 = vmatprep.mubr.f32.mxu0 %v7436_v47 }
 0x463   : > { %3374 = vmatmul.mubr.f32.vlgmr.msra.gmra.mrb[16].mxu0 %v6725_v59  ;;  %v7468_v59 = vld [vmem:[#allocation10_spill] sm:$0xff] }
 0x464   : > { %4925 = vmatpush1.bf16.msra.mxu0 %v6766_v13  ;;  %3379 = vmatprep.mubr.f32.mxu0 %v7436_v47 }
 0x465   : > { %4927 = vmatprep.subr.bf16.mxu0 %v6806_v37 }
 0x467   : > { %3382 = vmatmul.mubr.f32.gmra.mrb[18].mxu0 %v6734_v10 }
 0x468   : > { %4929 = vmatpush1.bf16.msra.mxu0 %v6800_v29  ;;  %3387 = vmatprep.mubr.f32.mxu0 %v7436_v47 }
 0x469   : > { %4931 = vmatprep.subr.bf16.mxu0 %v6851_v35 }
 0x46b   : > { %3390 = vmatmul.mubr.f32.gmra.mrb[20].mxu0 %v6760_v40 }
 0x46c   : > { %4933 = vmatpush1.bf16.msra.mxu0 %v6846_v16  ;;  %3395 = vmatprep.mubr.f32.mxu0 %v7436_v47 }
 0x46d   : > { %4935 = vmatprep.subr.bf16.mxu0 %v6903_v4 }
 0x46f   : > { %3398 = vmatmul.mubr.f32.gmra.mrb[22].mxu0 %v6913_v56 }
 0x470   : > { %4937 = vmatpush1.bf16.msra.mxu0 %v6896_v48  ;;  %3403 = vmatprep.mubr.f32.mxu0 %v7436_v47 }
 0x471   : > { %4939 = vmatprep.subr.bf16.mxu0 %v6837_v41  ;;  %v7136_v41 = vpop.permute.xlu0 %2843 }
 0x473   : > { %3406 = vmatmul.mubr.f32.gmra.mrb[24].mxu0 %v6948_v24 }
 0x474   : > { %3411 = vmatprep.mubr.f32.mxu0 %v7436_v47 }
 0x477   : > { %3414 = vmatmul.mubr.f32.gmra.mrb[26].mxu0 %v6966_v54  ;;  %v3911_v54 = vld [vmem:[%s7411_s9] sm:$0x1] }
 0x478   : > { %3419 = vmatprep.mubr.f32.mxu0 %v7436_v47 }
 0x47b   : > { %3422 = vmatmul.mubr.f32.gmra.mrb[28].mxu0 %v6980_v28  ;;  %v3923_v28 = vsel %vm708_vm0, %v3911_v54, 0 }
 0x47c   : > { %3427 = vmatprep.mubr.f32.mxu0 %v7436_v47  ;;  %v7148_v36 = vand.u32 4294901760, %v3923_v28 }
 0x47f   : > { %3430 = vmatmul.mubr.f32.gmra.mrb[30].mxu0 %v6993_v2 }
 0x480   : > { %3516 = vmatprep.mubr.f32.mxu0 %v7436_v47 }
 0x483   : > { %3520 = vmatmul.mubr.f32.vlgmr.msra.gmra.mrb[16].mxu0 %v7464_v38  ;;  %v7165_v38 = vsub.f32 %v3923_v28, %v7148_v36 }
 0x484   : > { %4941 = vmatpush1.bf16.msra.mxu0 %v7465_v27  ;;  %3525 = vmatprep.mubr.f32.mxu0 %v7436_v47 }
 0x485   : > { %4943 = vmatprep.subr.bf16.mxu0 %v6884_v11  ;;  %v7469_v11 = vld [vmem:[#allocation11_spill] sm:$0xff] }
 0x487   : > { %3529 = vmatmul.mubr.f32.gmra.mrb[18].mxu0 %v7466_v50 }
 0x488   : > { %4945 = vmatpush1.bf16.msra.mxu0 %v6888_v53  ;;  %3534 = vmatprep.mubr.f32.mxu0 %v7436_v47 }
 0x489   : > { %4947 = vmatprep.subr.bf16.mxu0 %v7467_v46 }
 0x48b   : > { %3538 = vmatmul.mubr.f32.gmra.mrb[20].mxu0 %v3010_v43 }
 0x48c   : > { %4949 = vmatpush1.bf16.msra.mxu0 %v7468_v59  ;;  %3543 = vmatprep.mubr.f32.mxu0 %v7436_v47 }
 0x48d   : > { %4951 = vmatprep.subr.bf16.mxu0 %v6939_v12 }
 0x48f   : > { %3547 = vmatmul.mubr.f32.gmra.mrb[22].mxu0 %v3021_v33 }
 0x490   : > { %4953 = vmatpush1.bf16.msra.mxu0 %v7469_v11  ;;  %3552 = vmatprep.mubr.f32.mxu0 %v7436_v47 }
 0x491   : > { %4955 = vmatprep.subr.bf16.mxu0 %v6773_v58 }
 0x493   : > { %3556 = vmatmul.mubr.f32.gmra.mrb[24].mxu0 %v3032_v60 }
 0x494   : > { %3561 = vmatprep.mubr.f32.mxu0 %v7436_v47 }
 0x497   : > { %3565 = vmatmul.mubr.f32.gmra.mrb[26].mxu0 %v3043_v5 }
 0x498   : > { %3570 = vmatprep.mubr.f32.mxu0 %v7436_v47 }
 0x49b   : > { %3574 = vmatmul.mubr.f32.gmra.mrb[28].mxu0 %v3054_v62 }
 0x49c   : > { %3579 = vmatprep.mubr.f32.mxu0 %v7436_v47 }
 0x49f   : > { %3583 = vmatmul.mubr.f32.gmra.mrb[30].mxu0 %v3065_v1 }
 0x4a0   : > { %3701 = vmatprep.mubr.f32.mxu0 %v7436_v47 }
 0x4a3   : > { %3703 = vmatmul.mubr.f32.vlgmr.msra.gmra.mrb[16].mxu0 %v6721_v17 }
 0x4a4   : > { %4957 = vmatpush1.bf16.msra.mxu0 %v6766_v13  ;;  %3708 = vmatprep.mubr.f32.mxu0 %v7436_v47 }
 0x4a5   : > { %4959 = vmatprep.subr.bf16.mxu0 %v6806_v37 }
 0x4a7   : > { %3710 = vmatmul.mubr.f32.gmra.mrb[18].mxu0 %v6727_v31 }
 0x4a8   : > { %4961 = vmatpush1.bf16.msra.mxu0 %v6800_v29  ;;  %3715 = vmatprep.mubr.f32.mxu0 %v7436_v47 }
 0x4a9   : > { %4963 = vmatprep.subr.bf16.mxu0 %v6851_v35 }
 0x4ab   : > { %3717 = vmatmul.mubr.f32.gmra.mrb[20].mxu0 %v6743_v14 }
 0x4ac   : > { %4965 = vmatpush1.bf16.msra.mxu0 %v6846_v16  ;;  %3722 = vmatprep.mubr.f32.mxu0 %v7436_v47 }
 0x4ad   : > { %4967 = vmatprep.subr.bf16.mxu0 %v6903_v4 }
 0x4af   : > { %3724 = vmatmul.mubr.f32.gmra.mrb[22].mxu0 %v6862_v15 }
 0x4b0   : > { %4969 = vmatpush1.bf16.msra.mxu0 %v6896_v48  ;;  %3729 = vmatprep.mubr.f32.mxu0 %v7436_v47  ;;  %v2859_v48 = vpop.permute.xlu0 %2858 }
 0x4b3   : > { %3731 = vmatmul.mubr.f32.gmra.mrb[24].mxu0 %v6923_v63 }
 0x4b4   : > { %3736 = vmatprep.mubr.f32.mxu0 %v7436_v47  ;;  %v2864_v15 = vpop.permute.xlu0 %2863 }
 0x4b7   : > { %3738 = vmatmul.mubr.f32.gmra.mrb[26].mxu0 %v6950_v25 }
 0x4b8   : > { %3743 = vmatprep.mubr.f32.mxu0 %v7436_v47  ;;  %v2874_v21 = vpop.permute.xlu0 %2873 }
 0x4bb   : > { %3745 = vmatmul.mubr.f32.gmra.mrb[28].mxu0 %v6968_v26 }
 0x4bc   : > { %3750 = vmatprep.mubr.f32.mxu0 %v7436_v47 }
 0x4bf   : > { %3752 = vmatmul.mubr.f32.gmra.mrb[30].mxu0 %v6982_v42 }
 0x4c0   : > { %3838 = vmatprep.mubr.f32.mxu0 %v7436_v47 }
 0x4c3   : > { %3840 = vmatmul.mubr.f32.vlgmr.msra.gmra.mrb[16].mxu0 %v6721_v17  ;;  %v7138_v17 = vpop.permute.xlu1 %2848 }
 0x4c4   : > { %3845 = vmatprep.mubr.f32.mxu0 %v7436_v47 }
 0x4c7   : > { %3847 = vmatmul.mubr.f32.gmra.mrb[18].mxu0 %v6727_v31  ;;  %v7140_v35 = vpop.permute.xlu1 %2853 }
 0x4c8   : > { %3852 = vmatprep.mubr.f32.mxu0 %v7436_v47 }
 0x4cb   : > { %3854 = vmatmul.mubr.f32.gmra.mrb[20].mxu0 %v6743_v14  ;;  %v2869_v56 = vpop.permute.xlu1 %2868 }
 0x4cf   : > { %v2879_v44 = vpop.permute.xlu1 %2878 }
 0x4f6   : > { %v3862_v10 = vpop.f32.mrb[32].mxu1 }
 0x4f7   : > { %v3864_v24 = vpop.f32.mrb[33].mxu1 }
 0x4fa   : > { %v3869_v40 = vpop.f32.mrb[34].mxu1 }
 0x4fb   : > { %v3871_v13 = vpop.f32.mrb[35].mxu1 }
 0x4fe   : > { %v3876_v58 = vpop.f32.mrb[36].mxu1 }
 0x4ff   : > { %v3878_v29 = vpop.f32.mrb[37].mxu1 }
 0x502   : > { %v3883_v37 = vpop.f32.mrb[38].mxu1 }
 0x503   : > { %v3885_v30 = vpop.f32.mrb[39].mxu1 }
 0x506   : > { %v3890_v3 = vpop.f32.mrb[40].mxu1 }
 0x507   : > { %v3892_v25 = vpop.f32.mrb[41].mxu1 }
 0x582   : > { %v3725_v31 = vpop.f32.mrb[22].mxu0 }
 0x583   : > { %v5128_v16 = vadd.f32 %v3725_v31, %v2859_v48  ;;  %v3727_v22 = vpop.f32.mrb[23].mxu0 }
 0x584   : > { %v5130_v14 = vadd.f32 %v3727_v22, %v2859_v48 }
 0x585   : > { %v5129_v39 = vadd.f32 %v5128_v16, %v3862_v10 }
 0x586   : > { %v5131_v0 = vadd.f32 %v5130_v14, %v3864_v24  ;;  %v3732_v53 = vpop.f32.mrb[24].mxu0 }
 0x587   : > { %5523 = vtanh.f32 %v5129_v39  ;;  %v5132_v6 = vadd.f32 %v3732_v53, %v2864_v15  ;;  %v3734_v4 = vpop.f32.mrb[25].mxu0 }
 0x588   : > { %5525 = vtanh.f32 %v5131_v0  ;;  %v5134_v43 = vadd.f32 %v3734_v4, %v2864_v15 }
 0x589   : > { %v5133_v49 = vadd.f32 %v5132_v6, %v3869_v40 }
 0x58a   : > { %v5135_v12 = vadd.f32 %v5134_v43, %v3871_v13  ;;  %v3739_v63 = vpop.f32.mrb[26].mxu0 }
 0x58b   : > { %5527 = vtanh.f32 %v5133_v49  ;;  %v5136_v33 = vadd.f32 %v3739_v63, %v2869_v56  ;;  %v3741_v60 = vpop.f32.mrb[27].mxu0 }
 0x58c   : > { %5529 = vtanh.f32 %v5135_v12  ;;  %v5138_v26 = vadd.f32 %v3741_v60, %v2869_v56 }
 0x58d   : > { %v5137_v32 = vadd.f32 %v5136_v33, %v3876_v58 }
 0x58e   : > { %v5139_v18 = vadd.f32 %v5138_v26, %v3878_v29  ;;  %v3746_v5 = vpop.f32.mrb[28].mxu0 }
 0x58f   : > { %5531 = vtanh.f32 %v5137_v32  ;;  %v5140_v42 = vadd.f32 %v3746_v5, %v2874_v21  ;;  %v3748_v19 = vpop.f32.mrb[29].mxu0 }
 0x590   : > { %5533 = vtanh.f32 %v5139_v18  ;;  %v5142_v52 = vadd.f32 %v3748_v19, %v2874_v21 }
 0x591   : > { %v7146_v62 = vpop.eup %5523  ;;  %v5141_v2 = vadd.f32 %v5140_v42, %v3883_v37 }
 0x592   : > { %v7150_v57 = vpop.eup %5525  ;;  %v5143_v1 = vadd.f32 %v5142_v52, %v3885_v30  ;;  %v3753_v8 = vpop.f32.mrb[30].mxu0  ;;  %v3939_v61 = vand.u32 4294901760, %v7146_v62 }
 0x593   : > { %5535 = vtanh.f32 %v5141_v2  ;;  %v5144_v45 = vadd.f32 %v3753_v8, %v2879_v44  ;;  %v3755_v51 = vpop.f32.mrb[31].mxu0  ;;  %v3937_v20 = vand.u32 4294901760, %v7150_v57 }
 0x594   : > { %5537 = vtanh.f32 %v5143_v1  ;;  %v5146_v34 = vadd.f32 %v3755_v51, %v2879_v44  ;;  %v7157_v7 = vsub.f32 %v7146_v62, %v3939_v61 }
 0x595   : > { %v5528_v55 = vpop.eup %5527  ;;  %v5145_v9 = vadd.f32 %v5144_v45, %v3890_v3  ;;  %v7162_v23 = vsub.f32 %v7150_v57, %v3937_v20  ;;  %v4008_v3 = vand.u32 4294901760, %v7165_v38 }
 0x596   : > { %v5530_v27 = vpop.eup %5529  ;;  %v5147_v50 = vadd.f32 %v5146_v34, %v3892_v25  ;;  %v3841_v46 = vpop.f32.mrb[16].mxu0  ;;  %v3943_v59 = vand.u32 4294901760, %v5528_v55  ;;  %v4061_v11 = vand.u32 4294901760, %v7157_v7 }
 0x597   : > { %5539 = vtanh.f32 %v5145_v9  ;;  %v5122_v10 = vadd.f32 %v3841_v46, %v7136_v41  ;;  %v3843_v24 = vpop.f32.mrb[17].mxu0  ;;  %v3941_v40 = vand.u32 4294901760, %v5530_v27  ;;  %v4055_v13 = vand.u32 4294901760, %v7162_v23 }
 0x598   : > { %5541 = vtanh.f32 %v5147_v50  ;;  %v5123_v58 = vadd.f32 %v3843_v24, %v7136_v41  ;;  %v7171_v29 = vsub.f32 %v5528_v55, %v3943_v59  ;;  %v7179_v16 = vsub.f32 %v7157_v7, %v4061_v11 }
 0x599   : > { %v5532_v37 = vpop.eup %5531  ;;  %5543 = vtanh.f32 %v5122_v10  ;;  %v7173_v30 = vsub.f32 %v5530_v27, %v3941_v40  ;;  %v7186_v15 = vsub.f32 %v7162_v23, %v4055_v13 }
 0x59a   : > { %v5534_v25 = vpop.eup %5533  ;;  %5545 = vtanh.f32 %v5123_v58  ;;  %v3848_v48 = vpop.f32.mrb[18].mxu0  ;;  %v3947_v31 = vand.u32 4294901760, %v5532_v37  ;;  %v4073_v22 = vand.u32 4294901760, %v7171_v29 }
 0x59b   : > { %v5124_v41 = vadd.f32 %v3848_v48, %v7138_v17  ;;  %v3850_v14 = vpop.f32.mrb[19].mxu0  ;;  %v3945_v39 = vand.u32 4294901760, %v5534_v25  ;;  %v4067_v0 = vand.u32 4294901760, %v7173_v30 }
 0x59c   : > { %v5125_v53 = vadd.f32 %v3850_v14, %v7138_v17  ;;  %v7190_v6 = vpack.c.bf16 %v3947_v31, %v3943_v59  ;;  %v7192_v4 = vsub.f32 %v5532_v37, %v3947_v31  ;;  %v4074_v43 = vsub.f32 %v7171_v29, %v4073_v22 }
 0x59d   : > { %v5536_v49 = vpop.eup %5535  ;;  %5547 = vtanh.f32 %v5124_v41  ;;  %v7197_v56 = vpack.c.bf16 %v3945_v39, %v3941_v40  ;;  %v7199_v12 = vsub.f32 %v5534_v25, %v3945_v39  ;;  %v4068_v63 = vsub.f32 %v7173_v30, %v4067_v0 }
 0x59e   : > { %v5538_v33 = vpop.eup %5537  ;;  %5549 = vtanh.f32 %v5125_v53  ;;  %v3855_v60 = vpop.f32.mrb[20].mxu0  ;;  %v3951_v17 = vand.u32 4294901760, %v5536_v49  ;;  %v4075_v54 = vand.u32 4294901760, %v4074_v43  ;;  %v4085_v26 = vand.u32 4294901760, %v7192_v4 }
 0x59f   : > { %v5126_v32 = vadd.f32 %v3855_v60, %v7140_v35  ;;  %v3857_v21 = vpop.f32.mrb[21].mxu0  ;;  %v3949_v18 = vand.u32 4294901760, %v5538_v33  ;;  %v4069_v5 = vand.u32 4294901760, %v4068_v63  ;;  %v4079_v28 = vand.u32 4294901760, %v7199_v12 }
 0x5a0   : > { %v5127_v42 = vadd.f32 %v3857_v21, %v7140_v35  ;;  %v7206_v19 = vsub.f32 %v5536_v49, %v3951_v17  ;;  %v4086_v52 = vsub.f32 %v7192_v4, %v4085_v26  ;;  %v5010_v2 = vpack.c.bf16 %v7199_v12, %v7173_v30  ;;  %v3916_v30 = vpop.permute.xlu0 %3915 }
 0x5a1   : > { %v5540_v44 = vpop.eup %5539  ;;  %5551 = vtanh.f32 %v5126_v32  ;;  %v7211_v1 = vsub.f32 %v5538_v33, %v3949_v18  ;;  %v4080_v8 = vsub.f32 %v7199_v12, %v4079_v28  ;;  %v7218_v59 = vpack.c.bf16 %v4079_v28, %v4067_v0 }
 0x5a2   : > { %v5542_v51 = vpop.eup %5541  ;;  %5553 = vtanh.f32 %v5127_v42  ;;  %v3955_v34 = vand.u32 4294901760, %v5540_v44  ;;  %v4087_v35 = vand.u32 4294901760, %v4086_v52  ;;  %v4097_v55 = vand.u32 4294901760, %v7206_v19 }
 0x5a3   : > { %v5544_v9 = vpop.eup %5543  ;;  %v3953_v27 = vand.u32 4294901760, %v5542_v51  ;;  %v4081_v50 = vand.u32 4294901760, %v4080_v8  ;;  %v4091_v46 = vand.u32 4294901760, %v7211_v1 }
 0x5a4   : > { %v5546_v10 = vpop.eup %5545  ;;  %v3927_v24 = vand.u32 4294901760, %v5544_v9  ;;  %v7220_v40 = vpack.c.bf16 %v3955_v34, %v3951_v17  ;;  %v7222_v58 = vsub.f32 %v5540_v44, %v3955_v34  ;;  %v7224_v37 = vpack.c.bf16 %v4087_v35, %v4075_v54 }
 0x5a5   : > { %v3925_v25 = vand.u32 4294901760, %v5546_v10  ;;  %v7226_v48 = vpack.c.bf16 %v3953_v27, %v3949_v18  ;;  %v7228_v31 = vsub.f32 %v5542_v51, %v3953_v27  ;;  %v7230_v41 = vpack.c.bf16 %v4081_v50, %v4069_v5 }
 0x5a6   : > { %v7232_v14 = vsub.f32 %v5544_v9, %v3927_v24  ;;  %v4092_v39 = vsub.f32 %v7211_v1, %v4091_v46  ;;  %v4098_v0 = vsub.f32 %v7206_v19, %v4097_v55  ;;  %v4109_v53 = vand.u32 4294901760, %v7222_v58 }
 0x5a7   : > { %v5548_v43 = vpop.eup %5547  ;;  %v7241_v49 = vsub.f32 %v5546_v10, %v3925_v25  ;;  %v4103_v63 = vand.u32 4294901760, %v7228_v31  ;;  %v7261_v34 = vpack.c.bf16 %v4085_v26, %v4073_v22 }
 0x5a8   : > { %v5550_v17 = vpop.eup %5549  ;;  %v3931_v54 = vand.u32 4294901760, %v5548_v43  ;;  %v4025_v32 = vand.u32 4294901760, %v7232_v14  ;;  %v4093_v21 = vand.u32 4294901760, %v4092_v39  ;;  %v4099_v18 = vand.u32 4294901760, %v4098_v0 }
 0x5a9   : > { %v3929_v5 = vand.u32 4294901760, %v5550_v17  ;;  %v4019_v28 = vand.u32 4294901760, %v7241_v49  ;;  %v4104_v42 = vsub.f32 %v7228_v31, %v4103_v63  ;;  %v4110_v52 = vsub.f32 %v7222_v58, %v4109_v53 }
 0x5aa   : > { %v7254_v44 = vpack.c.bf16 %v3931_v54, %v3927_v24  ;;  %v7256_v8 = vsub.f32 %v5548_v43, %v3931_v54  ;;  %v4026_v51 = vsub.f32 %v7232_v14, %v4025_v32 }
 0x5ab   : > { %v5552_v35 = vpop.eup %5551  ;;  %v7263_v9 = vpack.c.bf16 %v3929_v5, %v3925_v25  ;;  %v7265_v27 = vsub.f32 %v5550_v17, %v3929_v5  ;;  %v4020_v50 = vsub.f32 %v7241_v49, %v4019_v28  ;;  %v4105_v10 = vand.u32 4294901760, %v4104_v42 }
 0x5ac   : > { %v5554_v39 = vpop.eup %5553  ;;  %v3935_v0 = vand.u32 4294901760, %v5552_v35  ;;  %v4027_v24 = vand.u32 4294901760, %v4026_v51  ;;  %v4037_v43 = vand.u32 4294901760, %v7256_v8  ;;  %v4111_v54 = vand.u32 4294901760, %v4110_v52 }
 0x5ad   : > { %4971 = vmatprep.subr.bf16.mxu1 %v7263_v9  ;;  %v3933_v60 = vand.u32 4294901760, %v5554_v39  ;;  %v4021_v33 = vand.u32 4294901760, %v4020_v50  ;;  %v4031_v22 = vand.u32 4294901760, %v7265_v27  ;;  %v4998_v26 = vpack.c.bf16 %v4105_v10, %v4093_v21 }
 0x5ae   : > { %4973 = vmatpush1.bf16.msra.mxu1 %v7254_v44  ;;  %v7274_v25 = vpack.c.bf16 %v3939_v61, %v3935_v0  ;;  %v4048_v17 = vsub.f32 %v5552_v35, %v3935_v0  ;;  %v4038_v5 = vsub.f32 %v7256_v8, %v4037_v43  ;;  %v5000_v42 = vpack.c.bf16 %v4111_v54, %v4099_v18 }
 0x5af   : > { %v7279_v52 = vpack.c.bf16 %v3937_v20, %v3933_v60  ;;  %v4042_v51 = vsub.f32 %v5554_v39, %v3933_v60  ;;  %v4032_v50 = vsub.f32 %v7265_v27, %v4031_v22  ;;  %v5002_v21 = vpack.c.bf16 %v7265_v27, %v7241_v49 }
 0x5b0   : > { %v4039_v10 = vand.u32 4294901760, %v4038_v5  ;;  %v4049_v45 = vand.u32 4294901760, %v4048_v17  ;;  %v5004_v62 = vpack.c.bf16 %v7256_v8, %v7232_v14  ;;  %v5008_v61 = vpack.c.bf16 %v7157_v7, %v4048_v17 }
 0x5b1   : > { %4975 = vmatprep.subr.bf16.mxu1 %v7279_v52  ;;  %v4033_v18 = vand.u32 4294901760, %v4032_v50  ;;  %v4043_v35 = vand.u32 4294901760, %v4042_v51  ;;  %v5006_v57 = vpack.c.bf16 %v7162_v23, %v4042_v51  ;;  %v5034_v20 = vpack.c.bf16 %v4031_v22, %v4019_v28 }
 0x5b2   : > { %4977 = vmatpush1.bf16.msra.mxu1 %v7274_v25  ;;  %v4988_v60 = vpack.c.bf16 %v4039_v10, %v4027_v24  ;;  %v4050_v39 = vsub.f32 %v4048_v17, %v4049_v45  ;;  %v5036_v0 = vpack.c.bf16 %v4037_v43, %v4025_v32  ;;  %v5040_v49 = vpack.c.bf16 %v4061_v11, %v4049_v45 }
 0x5b3   : > { %4979 = vmatprep.subr.bf16.mxu1 %v7197_v56  ;;  %v4986_v14 = vpack.c.bf16 %v4033_v18, %v4021_v33  ;;  %v4044_v8 = vsub.f32 %v4042_v51, %v4043_v35  ;;  %v5038_v27 = vpack.c.bf16 %v4055_v13, %v4043_v35  ;;  %v5046_v54 = vpack.c.bf16 %v4103_v63, %v4091_v46 }
 0x5b4   : > { %v4051_v5 = vand.u32 4294901760, %v4050_v39  ;;  %v4063_v28 = vand.u32 4294901760, %v7179_v16  ;;  %v5048_v32 = vpack.c.bf16 %v4109_v53, %v4097_v55  ;;  %v4009_v7 = vsub.f32 %v7165_v38, %v4008_v3 }
 0x5b5   : > { %v4045_v11 = vand.u32 4294901760, %v4044_v8  ;;  %v4057_v45 = vand.u32 4294901760, %v7186_v15  ;;  %v7470_v16 = vpack.c.bf16 %v7192_v4, %v7171_v29  ;;  %v7471_v15 = vpack.c.bf16 %v7228_v31, %v7211_v1 }
 0x5b6   : > { %4981 = vmatpush1.bf16.msra.mxu1 %v7190_v6  ;;  %v4992_v23 = vpack.c.bf16 %v4063_v28, %v4051_v5  ;;  %v4010_v46 = vand.u32 4294901760, %v4009_v7  ;;  %v7472_v55 = vpack.c.bf16 %v7222_v58, %v7206_v19 }
 0x5b7   : > { %4983 = vmatprep.subr.bf16.mxu1 %v7226_v48  ;;  %v4990_v13 = vpack.c.bf16 %v4057_v45, %v4045_v11 }
 0x5ba   : > { %4985 = vmatpush1.bf16.msra.mxu1 %v7220_v40 }
 0x5bb   : > { %4987 = vmatprep.subr.bf16.mxu1 %v4986_v14 }
 0x5bd   : > { %4011 = vmatmul.mubr.f32.vlgmr.msra.gmra.mrb[42].mxu1 %v4010_v46 }
 0x5be   : > { %4989 = vmatpush1.bf16.msra.mxu1 %v4988_v60  ;;  %4161 = vmatprep.mubr.f32.mxu1 %v7436_v47 }
 0x5bf   : > { %4991 = vmatprep.subr.bf16.mxu1 %v4990_v13 }
 0x5c2   : > { %4993 = vmatpush1.bf16.msra.mxu1 %v4992_v23 }
 0x5c3   : > { %4995 = vmatprep.subr.bf16.mxu1 %v7230_v41 }
 0x5c6   : > { %4997 = vmatpush1.bf16.msra.mxu1 %v7224_v37 }
 0x5c7   : > { %4999 = vmatprep.subr.bf16.mxu1 %v4998_v26 }
 0x5ca   : > { %5001 = vmatpush1.bf16.msra.mxu1 %v5000_v42 }
 0x5cb   : > { %5003 = vmatprep.subr.bf16.mxu1 %v5002_v21 }
 0x5cd   : > { %4163 = vmatmul.mubr.f32.vlgmr.msra.gmra.mrb[42].mxu1 %v7148_v36 }
 0x5ce   : > { %5005 = vmatpush1.bf16.msra.mxu1 %v5004_v62  ;;  %4265 = vmatprep.mubr.f32.mxu1 %v7436_v47 }
 0x5cf   : > { %5007 = vmatprep.subr.bf16.mxu1 %v5006_v57 }
 0x5d2   : > { %5009 = vmatpush1.bf16.msra.mxu1 %v5008_v61 }
 0x5d3   : > { %5011 = vmatprep.subr.bf16.mxu1 %v5010_v2  ;;  %v7474_v2 = vld [vmem:[#allocation6_spill] sm:$0xff] }
 0x5d6   : > { %5013 = vmatpush1.bf16.msra.mxu1 %v7470_v16 }
 0x5d7   : > { %5015 = vmatprep.subr.bf16.mxu1 %v7471_v15 }
 0x5da   : > { %5017 = vmatpush1.bf16.msra.mxu1 %v7472_v55 }
 0x5db   : > { %5019 = vmatprep.subr.bf16.mxu1 %v7263_v9 }
 0x5dd   : > { %4268 = vmatmul.mubr.f32.vlgmr.msra.gmra.mrb[42].mxu1 %v7165_v38  ;;  %v5622_v38 = vmov 1966171168  }
 0x5de   : > { %5021 = vmatpush1.bf16.msra.mxu1 %v7254_v44  ;;  %4354 = vmatprep.mubr.f32.mxu1 %v7436_v47  ;;  %v4576_v29 = vunpack.c.l.s4 %v5622_v38 }
 0x5df   : > { %5023 = vmatprep.subr.bf16.mxu1 %v7279_v52 }
 0x5e2   : > { %5025 = vmatpush1.bf16.msra.mxu1 %v7274_v25 }
 0x5e3   : > { %5027 = vmatprep.subr.bf16.mxu1 %v7197_v56 }
 0x5e6   : > { %5029 = vmatpush1.bf16.msra.mxu1 %v7190_v6 }
 0x5e7   : > { %5031 = vmatprep.subr.bf16.mxu1 %v7226_v48 }
 0x5ea   : > { %5033 = vmatpush1.bf16.msra.mxu1 %v7220_v40 }
 0x5eb   : > { %5035 = vmatprep.subr.bf16.mxu1 %v5034_v20 }
 0x5ed   : > { %4358 = vmatmul.mubr.f32.vlgmr.msra.gmra.mrb[42].mxu1 %v4008_v3  ;;  %v7473_v3 = vld [vmem:[#allocation7_spill] sm:$0xff] }
 0x5ee   : > { %5037 = vmatpush1.bf16.msra.mxu1 %v5036_v0  ;;  %4476 = vmatprep.mubr.f32.mxu1 %v7436_v47  ;;  %v3921_v4 = vrot.slane %v3916_v30, %v7473_v3 }
 0x5ef   : > { %5039 = vmatprep.subr.bf16.mxu1 %v5038_v27 }
 0x5f2   : > { %5041 = vmatpush1.bf16.msra.mxu1 %v5040_v49 }
 0x5f3   : > { %5043 = vmatprep.subr.bf16.mxu1 %v7218_v59 }
 0x5f6   : > { %5045 = vmatpush1.bf16.msra.mxu1 %v7261_v34 }
 0x5f7   : > { %5047 = vmatprep.subr.bf16.mxu1 %v5046_v54 }
 0x5fa   : > { %5049 = vmatpush1.bf16.msra.mxu1 %v5048_v32 }
 0x5fb   : > { %5051 = vmatprep.subr.bf16.mxu1 %v7263_v9 }
 0x5fd   : > { %4478 = vmatmul.mubr.f32.vlgmr.msra.gmra.mrb[42].mxu1 %v7148_v36 }
 0x5fe   : > { %5053 = vmatpush1.bf16.msra.mxu1 %v7254_v44  ;;  %4564 = vmatprep.mubr.f32.mxu1 %v7436_v47  ;;  %v4577_v47 = vunpack.c.0.s8 %v4576_v29 }
 0x5ff   : > { %5055 = vmatprep.subr.bf16.mxu1 %v7279_v52 }
 0x600   : > { %v4580_v1 = vsub.s32 %v4577_v47, %v7474_v2 }
 0x602   : > { %5057 = vmatpush1.bf16.msra.mxu1 %v7274_v25 }
 0x603   : > { %5059 = vmatprep.subr.bf16.mxu1 %v7197_v56 }
 0x606   : > { %5061 = vmatpush1.bf16.msra.mxu1 %v7190_v6 }
 0x607   : > { %5063 = vmatprep.subr.bf16.mxu1 %v7226_v48 }
 0x60a   : > { %5065 = vmatpush1.bf16.msra.mxu1 %v7220_v40  ;;  %v7475_v40 = vlaneseq }
 0x60c   : > { %vm4592_vm1 = vcmp.lt.s32.totalorder %v7475_v40, 256 }
 0x60d   : > { %4566 = vmatmul.mubr.f32.vlgmr.msra.gmra.mrb[42].mxu1 %v7148_v36 }
 0x6e0   : > { %v4567_v12 = vpop.f32.mrb[42].mxu1 }
 0x6e1   : > { %v5148_v19 = vadd.f32 %v4567_v12, %v3921_v4  ;;  %v4569_v56 = vpop.f32.mrb[43].mxu1 }
 0x6e2   : > { %v5149_v6 = vadd.f32 %v4569_v56, %v3921_v4 }
 0x6e4   : > { %v4574_v59 = vcombine.low %v5148_v19, %v5149_v6 }
 0x6e6   : > { %v4581_v36 = vrot.slane %v4574_v59, %v4580_v1 }
 0x6e8   : > { %v4588_v58 = vrot.slane %v4581_v36, %v4580_v1 }
 0x6ea   : > { %4594 = vst.msk [vmem:[%s382_s17] sm:$0x3] %vm4592_vm1, %v4588_v58 }
 0x6eb   : > { %5568 = shalt.err (!%p5565_p3)
}
 0x6ec   : > { %s5569_s14 = scalar_lea.hbm %s7360_s26, 32  ;;  %s5573_s23 = scalar_lea.hbm %s7413_s11, 64 }
 0x6ed   : > { %p5570_p4 = scmp.ne.s32.totalorder %s7360_s26, %s5569_s14  ;;  %p5574_p9 = scmp.lt.u32.totalorder %s7360_s26, %s7413_s11 }
 0x6ee   : > { %p5575_p10 = scmp.lt.u32.totalorder %s5573_s23, %s5569_s14  ;;  %p5577_p12 = scmp.lt.u32.totalorder %s5569_s14, %s7360_s26 }
 0x6ef   : > { %p5571_p7 = pnand %p5570_p4, %p5725_p5 }
 0x6f0   : > { %p5576_p11 = por %p5575_p10, %p5574_p9 }
 0x6f1   : > { %p5572_p8 = pneg %p5571_p7 }
 0x6f2   : > { %p5578_p13 = por %p5577_p12, %p5576_p11 }
 0x6f4   : > { %p5579_p0 = pnand %p5578_p13, %p5572_p8 }
 0x6f6   : > { %5582 = shalt.err (!%p5579_p0)
}
 0x6f7   : > { %5374 = dma.vmem_to_hbm [thread:$0]  (%p5725_p5), %s7362_s18, 32, %s7360_s26, %s4596_s30  }
 0x6f8 PF: > { %p5380_p1 = scmp.ge.s32.totalorder %s5617_s22, 2  ;;  %s4622_s12 = sand.u32 1, %s5605_s19  }
 0x6f9   : > { %s4623_s13 = scalar_lea.sflag [#allocation4], %s4622_s12 }
 0x6fa   : > { %p5377_p2 = pnand %p5380_p1, %p5729_p6 }
 0x6fc   : > { %5600 = dma.done.wait (!%p5377_p2), %s4623_s13, 32  }
 0x6fd   : > { %5602 = vsyncadd (!%p5377_p2), %s4623_s13, 4294967264  ;;  %p23_p3 = scmp.ge.s32.totalorder %s5712_s24, 4   ;;  %s7476_s19 = smov %s5609_s20 }
 0x6fe   : > { %s7477_s20 = smov %s5613_s21  ;;  %s7478_s21 = smov %s5723_s27 }
 0x6ff   : > { %s7479_s22 = smov %s5712_s24  ;;  %25 = sbr.rel (!%p23_p3) target bundleno = 6 (0x6), region = 99 }
 0x706   :  { %4628 = vsyncpa [#allocation4], 1 }
 0x707   :  { %4630 = vsyncpa [#allocation4 + $0x1], 1 }

</bundles_post_ra>
